<compile_context>
chip_gen: v7x
topology: tpu7x:2x2x1
jax: 0.10.0
libtpu: 0.0.40
codegen_flags: <defaults>
</compile_context>

<pallas_src>
import jax
import jax.numpy as jnp
from jax import lax
from jax.experimental import pallas as pl
from jax.experimental.pallas import tpu as pltpu


LANE = 128        # lane width: hidden features padded up to multiples of this
OUT_ROWS = 8      # final result is an (OUT_ROWS, batch) lane-dense slab; row 0 is real


def _round_up(n, m):
    return ((n + m - 1) // m) * m


# ----------------------------- Pallas kernel --------------------------------


def mlp_kernel(x_ref, w3_ref, b3_ref, w4_ref, b4_ref, w5_ref, b5_ref, w6_ref, out_ref):
    f32 = jnp.float32
    bf16 = jnp.bfloat16

    # global_mlp layer 0: x = [d1 | d2 | c | 0-pad]  @ W3 (rows zero-padded to match)
    g = jnp.dot(x_ref[...], w3_ref[...], preferred_element_type=f32) + b3_ref[...]
    g = jnp.maximum(g, 0.0).astype(bf16)                      # (bt, 256)

    # global_mlp layer 1: Linear(256,128) -> ReLU
    g = jnp.dot(g, w4_ref[...], preferred_element_type=f32) + b4_ref[...]
    g = jnp.maximum(g, 0.0).astype(bf16)                      # (bt, 128)

    # global_mlp layer 2: Linear(128,64 padded to 128) -> ReLU
    g = jnp.dot(g, w5_ref[...], preferred_element_type=f32) + b5_ref[...]
    g = jnp.maximum(g, 0.0).astype(bf16)                      # (bt, 128); cols >= 64 exactly 0

    # final Linear(64,1) lane-dense: out[r, b] = sum_f w6[r, f] * g[b, f]
    # rhs-transposed contraction; rows 1..7 of the (8, bt) result are exactly zero
    # (their weight rows are zero); bias b6 is added in the wrapper after slicing row 0.
    out_ref[...] = lax.dot_general(w6_ref[...], g, (((1,), (1,)), ((), ())),
                                   preferred_element_type=f32)


# ----------------------------- parameter prep --------------------------------


def prepare_params(params, dim, compute_dtype=jnp.bfloat16):
    """Zero-pad lane widths to multiples of 128, build the (8, h3) final-weight slab,
    cast the kernel-resident weights to bf16. Cell-MLP params stay f32 (used in wrapper)."""
    (w1, b1, w2, b2, w3, b3, w4, b4, w5, b5, w6, b6) = params

    global_in = 2 * dim + w2.shape[1]                 # 2*dim + 64
    k_pad = _round_up(global_in, LANE)                # padded x lane width
    h1 = _round_up(w3.shape[1], LANE)
    h2 = _round_up(w4.shape[1], LANE)
    h3 = _round_up(w5.shape[1], LANE)

    def pad_w(w, rows, cols):
        return jnp.pad(w, ((0, rows - w.shape[0]), (0, cols - w.shape[1])))

    def pad_b(b, cols):
        return jnp.pad(b, ((0, 0), (0, cols - b.shape[1])))

    w3p, b3p = pad_w(w3, k_pad, h1), pad_b(b3, h1)
    w4p, b4p = pad_w(w4, h1, h2), pad_b(b4, h2)
    w5p, b5p = pad_w(w5, h2, h3), pad_b(b5, h3)

    # (8, h3) slab; row 0 holds w6^T, rows 1..7 are zero -> lane-dense final matmul.
    w6_slab = jnp.zeros((OUT_ROWS, h3), w6.dtype).at[0, :w6.shape[0]].set(w6[:, 0])

    cast = lambda a: a.astype(compute_dtype)
    kernel_params = (cast(w3p), b3p, cast(w4p), b4p, cast(w5p), b5p, cast(w6_slab))
    cell_params = (w1, b1, w2, b2)
    return cell_params, kernel_params, b6, k_pad


# ----------------------------- tiling heuristic -------------------------------


def _choose_tiling(batch, *, align=256, max_tile=2048):
    """1-2+ fat grid steps: per-step pipeline bookkeeping (~0.35us) dominates these tiny
    layers, so fewer/fatter tiles win. Keep an EVEN step count >= 2 when the batch allows
    so v7x's two TensorCores both get work; on v5e/v6e the extra step is ~0.35us, noise."""
    bp = _round_up(batch, align)
    if bp < 2 * align:
        return bp, bp, 1                          # single tiny tile
    n_tiles = max(2, -(-bp // max_tile))
    if n_tiles % 2:
        n_tiles += 1                              # even -> balanced across 2 TCs on v7x
    tile = _round_up(-(-bp // n_tiles), align)
    return n_tiles * tile, tile, n_tiles


# ----------------------------- wrapper ---------------------------------------


def mlp_forward(d1, d2, context_ids, encoding, params, *, batch_tile=None,
                compute_dtype=jnp.bfloat16):
    """d1/d2: (B, dim) drug embeddings; context_ids: (B,) int; encoding: (n_cell, cell_dim)."""
    B = d1.shape[0]
    dim = d1.shape[1]

    (w1, b1, w2, b2), kparams, b6, k_pad = prepare_params(params, dim, compute_dtype)
    (w3p, b3p, w4p, b4p, w5p, b5p, w6s) = kparams

    # cell_line_mlp hoisted onto the unique encoding table (f32, exact), then gathered.
    # TODO(synk): for very large encoding tables, fuse this gather into the kernel via
    # scalar-prefetched context_ids instead of materializing c in HBM; cheap glue here.
    h = jnp.maximum(encoding @ w1 + b1, 0.0)
    c_table = jnp.maximum(h @ w2 + b2, 0.0)                  # (n_cell, 64)
    c = c_table[context_ids]                                 # (B, 64)

    # One lane-dense streamed input: [d1 | d2 | c | 0-pad] -> (B, k_pad) bf16.
    x = jnp.concatenate([d1, d2, c], axis=1).astype(compute_dtype)
    x = jnp.pad(x, ((0, 0), (0, k_pad - x.shape[1])))

    # Tile the batch (padded rows are dead, sliced off afterwards).
    if batch_tile is None:
        bp, batch_tile, n_tiles = _choose_tiling(B)
    else:
        n_tiles = pl.cdiv(B, batch_tile)
        bp = n_tiles * batch_tile
    if bp != B:
        x = jnp.pad(x, ((0, bp - B), (0, 0)))

    h1, h2, h3 = w3p.shape[1], w4p.shape[1], w5p.shape[1]

    const = lambda a: pl.BlockSpec(a.shape, lambda i: (0, 0))
    in_specs = [
        pl.BlockSpec((batch_tile, k_pad), lambda i: (i, 0)),
        const(w3p), const(b3p), const(w4p), const(b4p),
        const(w5p), const(b5p), const(w6s),
    ]
    out_spec = pl.BlockSpec((OUT_ROWS, batch_tile), lambda i: (0, i))

    itemsize = jnp.dtype(compute_dtype).itemsize
    cost = pl.CostEstimate(
        flops=2 * bp * (k_pad * h1 + h1 * h2 + h2 * h3 + h3 * OUT_ROWS),
        transcendentals=0,
        bytes_accessed=(bp * k_pad * itemsize
                        + (w3p.size + w4p.size + w5p.size + w6s.size) * itemsize
                        + (b3p.size + b4p.size + b5p.size) * 4
                        + OUT_ROWS * bp * 4),
    )

    out = pl.pallas_call(
        mlp_kernel,
        out_shape=jax.ShapeDtypeStruct((OUT_ROWS, bp), jnp.float32),
        grid=(n_tiles,),
        in_specs=in_specs,
        out_specs=out_spec,
        compiler_params=pltpu.CompilerParams(
            dimension_semantics=("parallel",)),
        cost_estimate=cost,
    )(x, w3p, b3p, w4p, b4p, w5p, b5p, w6s)

    # Row 0 is the real result; final scalar bias added here (fuses into the slice).
    return out[0, :B].reshape(B, 1) + b6


# ----------------------------- reference (plain JAX, f32) ---------------------


def mlp_reference(cell_feats, d1, d2, params):
    (w1, b1, w2, b2, w3, b3, w4, b4, w5, b5, w6, b6) = params
    h = jnp.maximum(cell_feats @ w1 + b1, 0.0)
    c = jnp.maximum(h @ w2 + b2, 0.0)
    x = jnp.concatenate([d1, d2, c], axis=1)
    g = jnp.maximum(x @ w3 + b3, 0.0)
    g = jnp.maximum(g @ w4 + b4, 0.0)
    g = jnp.maximum(g @ w5 + b5, 0.0)
    return g @ w6 + b6


# ----------------------------- driver ----------------------------------------


def init_params(key, dim, cell_dim, hidden_dims=(256, 128, 64)):
    """Deterministic synthetic init; shapes match the torch module (batch_norm=False)."""
    global_in = 2 * dim + 64
    dims = [
        (cell_dim, 128), (128, 64),                  # cell_line_mlp
        (global_in, hidden_dims[0]),                 # global_mlp
        (hidden_dims[0], hidden_dims[1]),
        (hidden_dims[1], hidden_dims[2]),
        (hidden_dims[2], 1),
    ]
    params = []
    for (fan_in, fan_out) in dims:
        key, kw, kb = jax.random.split(key, 3)
        scale = 1.0 / jnp.sqrt(jnp.float32(fan_in))
        w = jax.random.uniform(kw, (fan_in, fan_out), jnp.float32, -scale, scale)
        b = jax.random.uniform(kb, (1, fan_out), jnp.float32, -scale, scale)
        params += [w, b]
    return tuple(params)


if __name__ == "__main__":
    key = jax.random.PRNGKey(0)

    B = 512           # batch of drug-pair samples (auto-tiles to 2 x 256 -> both v7x TCs busy)
    DIM = 32          # drug embedding dim ("dim" ctor arg)
    CELL_DIM = 64     # cell-line feature dim (synthetic stand-in for CCLE PCA features)
    N_CELL_LINES = 16

    k_enc, k_d1, k_d2, k_ctx, k_params = jax.random.split(key, 5)

    # Synthetic stand-ins for the file-loaded data (no .pt/.json loading).
    encoding = jax.random.normal(k_enc, (N_CELL_LINES, CELL_DIM), jnp.float32)
    d1_embd = jax.random.normal(k_d1, (B, DIM), jnp.float32)
    d2_embd = jax.random.normal(k_d2, (B, DIM), jnp.float32)
    context_ids = jax.random.randint(k_ctx, (B,), 0, N_CELL_LINES)

    params = init_params(k_params, DIM, CELL_DIM)

    out = mlp_forward(d1_embd, d2_embd, context_ids, encoding, params)
    out = jax.block_until_ready(out)

    cell_feats = encoding[context_ids]
    ref = mlp_reference(cell_feats, d1_embd, d2_embd, params)
    assert out.shape == (B, 1)
    max_err = float(jnp.max(jnp.abs(out - ref)))
    # bf16 matmuls with f32 accumulation vs. the f32 reference -> loosened tolerance.
    assert jnp.allclose(out, ref, atol=3e-2, rtol=3e-2), f"Pallas mismatch, max abs err={max_err}"

    # TODO(synk): use_mono_response=True path (pandas index lookup) has no in-kernel equivalent;
    # if the mono-response table were provided as an array it would fold into the same
    # lane-concat + zero-padded-W3 trick as d1/d2/c.
    print("KERNEL_OK")
</pallas_src>

<mosaic_0001>
module attributes {stable_mosaic.version = 11 : i64} {
  func.func @mlp_kernel(%arg0: i32, %arg1: memref<256x128xbf16, #tpu.memory_space<vmem>>, %arg2: memref<128x256xbf16, #tpu.memory_space<vmem>>, %arg3: memref<1x256xf32, #tpu.memory_space<vmem>>, %arg4: memref<256x128xbf16, #tpu.memory_space<vmem>>, %arg5: memref<1x128xf32, #tpu.memory_space<vmem>>, %arg6: memref<128x128xbf16, #tpu.memory_space<vmem>>, %arg7: memref<1x128xf32, #tpu.memory_space<vmem>>, %arg8: memref<8x128xbf16, #tpu.memory_space<vmem>>, %arg9: memref<8x256xf32, #tpu.memory_space<vmem>>) attributes {dimension_semantics = [#tpu.dimension_semantics<parallel>], iteration_bounds = array<i64: 2>, scalar_prefetch = 0 : i64, scratch_operands = 0 : i64, tpu.core_type = #tpu.core_type<tc>, window_params = [{transform_indices = @transform_0, window_bounds = array<i64: 256, 128>}, {pipeline_mode = #tpu.pipeline_mode<synchronous>, transform_indices = @transform_1, window_bounds = array<i64: 128, 256>}, {pipeline_mode = #tpu.pipeline_mode<synchronous>, transform_indices = @transform_2, window_bounds = array<i64: 1, 256>}, {pipeline_mode = #tpu.pipeline_mode<synchronous>, transform_indices = @transform_3, window_bounds = array<i64: 256, 128>}, {pipeline_mode = #tpu.pipeline_mode<synchronous>, transform_indices = @transform_4, window_bounds = array<i64: 1, 128>}, {pipeline_mode = #tpu.pipeline_mode<synchronous>, transform_indices = @transform_5, window_bounds = array<i64: 128, 128>}, {pipeline_mode = #tpu.pipeline_mode<synchronous>, transform_indices = @transform_6, window_bounds = array<i64: 1, 128>}, {pipeline_mode = #tpu.pipeline_mode<synchronous>, transform_indices = @transform_7, window_bounds = array<i64: 8, 128>}, {transform_indices = @transform_8, window_bounds = array<i64: 8, 256>}]} {
    %c0 = arith.constant 0 : index
    %c0_0 = arith.constant 0 : index
    %0 = vector.load %arg1[%c0, %c0_0] : memref<256x128xbf16, #tpu.memory_space<vmem>>, vector<256x128xbf16>
    %c0_1 = arith.constant 0 : index
    %c0_2 = arith.constant 0 : index
    %1 = vector.load %arg2[%c0_1, %c0_2] : memref<128x256xbf16, #tpu.memory_space<vmem>>, vector<128x256xbf16>
    %cst = arith.constant dense<0.000000e+00> : vector<256x256xf32>
    %2 = tpu.matmul %0, %1, %cst {dimension_numbers = #tpu.dot_dimension_numbers<[1], [0], [0], [1], [0, 0, 1, 1], [], []>} : vector<256x128xbf16>, vector<128x256xbf16>, vector<256x256xf32> -> vector<256x256xf32>
    %c0_3 = arith.constant 0 : index
    %c0_4 = arith.constant 0 : index
    %3 = vector.load %arg3[%c0_3, %c0_4] : memref<1x256xf32, #tpu.memory_space<vmem>>, vector<1x256xf32>
    %4 = vector.broadcast %3 : vector<1x256xf32> to vector<256x256xf32>
    %5 = arith.addf %2, %4 : vector<256x256xf32>
    %cst_5 = arith.constant 0.000000e+00 : f32
    %6 = vector.broadcast %cst_5 : f32 to vector<256x256xf32>
    %7 = arith.maximumf %5, %6 : vector<256x256xf32>
    %8 = arith.truncf %7 : vector<256x256xf32> to vector<256x256xbf16>
    %c0_6 = arith.constant 0 : index
    %c0_7 = arith.constant 0 : index
    %9 = vector.load %arg4[%c0_6, %c0_7] : memref<256x128xbf16, #tpu.memory_space<vmem>>, vector<256x128xbf16>
    %cst_8 = arith.constant dense<0.000000e+00> : vector<256x128xf32>
    %10 = tpu.matmul %8, %9, %cst_8 {dimension_numbers = #tpu.dot_dimension_numbers<[1], [0], [0], [1], [0, 0, 1, 1], [], []>} : vector<256x256xbf16>, vector<256x128xbf16>, vector<256x128xf32> -> vector<256x128xf32>
    %c0_9 = arith.constant 0 : index
    %c0_10 = arith.constant 0 : index
    %11 = vector.load %arg5[%c0_9, %c0_10] : memref<1x128xf32, #tpu.memory_space<vmem>>, vector<1x128xf32>
    %12 = vector.broadcast %11 : vector<1x128xf32> to vector<256x128xf32>
    %13 = arith.addf %10, %12 : vector<256x128xf32>
    %cst_11 = arith.constant 0.000000e+00 : f32
    %14 = vector.broadcast %cst_11 : f32 to vector<256x128xf32>
    %15 = arith.maximumf %13, %14 : vector<256x128xf32>
    %16 = arith.truncf %15 : vector<256x128xf32> to vector<256x128xbf16>
    %c0_12 = arith.constant 0 : index
    %c0_13 = arith.constant 0 : index
    %17 = vector.load %arg6[%c0_12, %c0_13] : memref<128x128xbf16, #tpu.memory_space<vmem>>, vector<128x128xbf16>
    %cst_14 = arith.constant dense<0.000000e+00> : vector<256x128xf32>
    %18 = tpu.matmul %16, %17, %cst_14 {dimension_numbers = #tpu.dot_dimension_numbers<[1], [0], [0], [1], [0, 0, 1, 1], [], []>} : vector<256x128xbf16>, vector<128x128xbf16>, vector<256x128xf32> -> vector<256x128xf32>
    %c0_15 = arith.constant 0 : index
    %c0_16 = arith.constant 0 : index
    %19 = vector.load %arg7[%c0_15, %c0_16] : memref<1x128xf32, #tpu.memory_space<vmem>>, vector<1x128xf32>
    %20 = vector.broadcast %19 : vector<1x128xf32> to vector<256x128xf32>
    %21 = arith.addf %18, %20 : vector<256x128xf32>
    %cst_17 = arith.constant 0.000000e+00 : f32
    %22 = vector.broadcast %cst_17 : f32 to vector<256x128xf32>
    %23 = arith.maximumf %21, %22 : vector<256x128xf32>
    %24 = arith.truncf %23 : vector<256x128xf32> to vector<256x128xbf16>
    %c0_18 = arith.constant 0 : index
    %c0_19 = arith.constant 0 : index
    %25 = vector.load %arg8[%c0_18, %c0_19] : memref<8x128xbf16, #tpu.memory_space<vmem>>, vector<8x128xbf16>
    %cst_20 = arith.constant dense<0.000000e+00> : vector<8x256xf32>
    %26 = tpu.matmul %25, %24, %cst_20 {dimension_numbers = #tpu.dot_dimension_numbers<[1], [1], [0], [0], [0, 0, 1, 0], [], []>} : vector<8x128xbf16>, vector<256x128xbf16>, vector<8x256xf32> -> vector<8x256xf32>
    %c0_21 = arith.constant 0 : index
    %c0_22 = arith.constant 0 : index
    %27 = vector.load %arg9[%c0_21, %c0_22] : memref<8x256xf32, #tpu.memory_space<vmem>>, vector<8x256xf32>
    tpu.vector_store %arg9[%c0_21, %c0_22], %26 {strides = array<i32>} : memref<8x256xf32, #tpu.memory_space<vmem>>, vector<8x256xf32>,
    return
  }
  func.func @transform_0(%arg0: i32) -> (i32, i32) {
    %c0_i32 = arith.constant 0 : i32
    %c0_i32_0 = arith.constant 0 : i32
    return %arg0, %c0_i32 : i32, i32
  }
  func.func @transform_1(%arg0: i32) -> (i32, i32) {
    %c0_i32 = arith.constant 0 : i32
    %c0_i32_0 = arith.constant 0 : i32
    %c0_i32_1 = arith.constant 0 : i32
    return %c0_i32, %c0_i32_0 : i32, i32
  }
  func.func @transform_2(%arg0: i32) -> (i32, i32) {
    %c0_i32 = arith.constant 0 : i32
    %c0_i32_0 = arith.constant 0 : i32
    %c0_i32_1 = arith.constant 0 : i32
    return %c0_i32, %c0_i32_0 : i32, i32
  }
  func.func @transform_3(%arg0: i32) -> (i32, i32) {
    %c0_i32 = arith.constant 0 : i32
    %c0_i32_0 = arith.constant 0 : i32
    %c0_i32_1 = arith.constant 0 : i32
    return %c0_i32, %c0_i32_0 : i32, i32
  }
  func.func @transform_4(%arg0: i32) -> (i32, i32) {
    %c0_i32 = arith.constant 0 : i32
    %c0_i32_0 = arith.constant 0 : i32
    %c0_i32_1 = arith.constant 0 : i32
    return %c0_i32, %c0_i32_0 : i32, i32
  }
  func.func @transform_5(%arg0: i32) -> (i32, i32) {
    %c0_i32 = arith.constant 0 : i32
    %c0_i32_0 = arith.constant 0 : i32
    %c0_i32_1 = arith.constant 0 : i32
    return %c0_i32, %c0_i32_0 : i32, i32
  }
  func.func @transform_6(%arg0: i32) -> (i32, i32) {
    %c0_i32 = arith.constant 0 : i32
    %c0_i32_0 = arith.constant 0 : i32
    %c0_i32_1 = arith.constant 0 : i32
    return %c0_i32, %c0_i32_0 : i32, i32
  }
  func.func @transform_7(%arg0: i32) -> (i32, i32) {
    %c0_i32 = arith.constant 0 : i32
    %c0_i32_0 = arith.constant 0 : i32
    %c0_i32_1 = arith.constant 0 : i32
    return %c0_i32, %c0_i32_0 : i32, i32
  }
  func.func @transform_8(%arg0: i32) -> (i32, i32) {
    %c0_i32 = arith.constant 0 : i32
    %c0_i32_0 = arith.constant 0 : i32
    return %c0_i32, %arg0 : i32, i32
  }
}

</mosaic_0001>

<bundles_post_ra>
// kernel: tpu_custom_call.1
= control target key start
LH: loop header
LB: loop body
LE: loop exit
PB: predicated region body
PF: predicated region fallthrough
CT: control target
= control target key end

     0   :  { %s2819_s0 = inlined_call_operand.hbm [shape: bf16[512,128], index: 0, kind: input, shape index: {}]   ;;  %s2820_s1 = inlined_call_operand.hbm [shape: bf16[128,256], index: 1, kind: input, shape index: {}]   ;;  %s2821_s2 = inlined_call_operand.vmem [shape: f32[1,256], index: 2, kind: input, shape index: {}]   ;;  %s2822_s3 = inlined_call_operand.hbm [shape: bf16[256,128], index: 3, kind: input, shape index: {}]   ;;  %s2823_s4 = inlined_call_operand.vmem [shape: f32[1,128], index: 4, kind: input, shape index: {}]   ;;  %s2824_s5 = inlined_call_operand.hbm [shape: bf16[128,128], index: 5, kind: input, shape index: {}]   ;;  %s2825_s6 = inlined_call_operand.vmem [shape: f32[1,128], index: 6, kind: input, shape index: {}]   ;;  %s2826_s7 = inlined_call_operand.vmem [shape: bf16[8,128], index: 7, kind: input, shape index: {}]   ;;  %s2827_s8 = inlined_call_operand.hbm [shape: f32[8,512], index: 8, kind: output, shape index: {}]  }
   0x1   :  { %2833 = sst [smem:[#allocation17_spill]] %s2820_s1 }
   0x2   :  { %13 = vsyncpa [#allocation3], 0 }
   0x3   :  { %15 = vsyncpa [#allocation3 + $0x1], 0 }
   0x4   :  { %16 = vsyncpa [#allocation6], 0 }
   0x5   :  { %17 = vsyncpa [#allocation9], 0 }
   0x6   :  { %18 = vsyncpa [#allocation4], 0 }
   0x7   :  { %20 = vsyncpa [#allocation4 + $0x1], 0  ;;  %s2351_s27 = smov 0   ;;  %s2353_s28 = smov 0  }
   0x8   :  { %s2355_s29 = smov 0   ;;  %s2357_s30 = smov 0  }
   0x9 LB: > { %2834 = sst [smem:[#allocation15_spill]] %s2282_s27  ;;  %s2372_s9 = sadd.s32 4294967295, %s2294_s30   ;;  %s2294_s30 = sphi %s2357_s30, %s2858_s30   ;;  %s2290_s29 = sphi %s2355_s29, %s2857_s29   ;;  %s2286_s28 = sphi %s2353_s28, %s2856_s28   ;;  %s2282_s27 = sphi %s2351_s27, %s2855_s27  }
   0xa   : > { %s1678_s10 = sadd.s32 4294967294, %s2294_s30   ;;  %p46_p0 = scmp.ne.s32.totalorder %s2286_s28, %s2282_s27 }
   0xb   : > { %p2828_p1 = scmp.eq.s32.totalorder %s2372_s9, 0  ;;  %p223_p3 = scmp.eq.s32.totalorder %s1678_s10, 1 }
   0xc   : > { %p1679_p5 = scmp.ge.s32.totalorder %s2294_s30, 1  ;;  %p230_p7 = scmp.lt.s32.totalorder %s2294_s30, 3 }
   0xd   : > { %p2381_p4 = por %p2828_p1, %p46_p0  ;;  %p2386_p6 = por %p223_p3, %p46_p0 }
   0xe   : > { %p2391_p8 = pnand %p1679_p5, %p230_p7  ;;  %s2296_s14 = smov [#allocation5]  }
   0xf   : > { %s2835_s11 = scalar_select %p2381_p4, 1, 0 }
  0x10   : > { %s2836_s12 = scalar_select %p2386_p6, 1, 0 }
  0x11   : > { %s2838_s13 = scalar_select %p2391_p8, 1, 0 }
  0x12   : > { %2837 = sst [smem:[#allocation16_spill]] %s2836_s12  ;;  %s242_s15 = sshll.u32 %s2296_s14, 4  ;;  %s2395_s15 = int_to_ptr.vmem [resolvable:$true] %s242_s15 }
  0x13   : > { %p1976_p9 = pneg %p2391_p8  ;;  %s2297_s17 = smov [#allocation7]  }
  0x14   : > { %s258_s18 = sshll.u32 %s2297_s17, 4  ;;  %s2840_s1 = sld [smem:[#allocation17_spill]]  ;;  %s2406_s18 = int_to_ptr.vmem [resolvable:$true] %s258_s18 }
  0x15   : > { %p2402_p11 = pnand %p1976_p9, %p2828_p1 }
  0x17   : > { %p2416_p13 = pneg %p2402_p11 }
  0x1a   : > { %s2106_s21 = scalar_lea.hbm %s2840_s1, 2048 }
  0x1b   : > { %p2107_p12 = scmp.ne.s32.totalorder %s2840_s1, %s2106_s21  ;;  %p2113_p5 = scmp.lt.u32.totalorder %s2106_s21, %s2840_s1 }
  0x1d   : > { %p2109_p0 = pnand %p2416_p13, %p2107_p12 }
  0x1f   : > { %p2110_p3 = pneg %p2109_p0 }
  0x21   : > { %p2115_p7 = pnand %p2113_p5, %p2110_p3 }
  0x23   : > { %2118 = shalt.err (!%p2115_p7)
}
  0x24   : > { %s2119_s10 = scalar_lea.vmem %s2395_s15, 2048  ;;  %p2127_p2 = scmp.lt.s32.totalorder %s2395_s15, %s2395_s15 }
  0x25   : > { %p2120_p9 = scmp.ne.s32.totalorder %s2395_s15, %s2119_s10  ;;  %p2128_p6 = scmp.lt.s32.totalorder %s2119_s10, %s2119_s10 }
  0x27   : > { %p2122_p10 = pnand %p2120_p9, %p2416_p13  ;;  %p2129_p12 = por %p2128_p6, %p2127_p2 }
  0x29   : > { %p2123_p1 = pneg %p2122_p10 }
  0x2b   : > { %p2130_p0 = pnand %p2129_p12, %p2123_p1 }
  0x2d   : > { %2133 = shalt.err (!%p2130_p0)
}
  0x2e   : > { %s2298_s14 = smov 128   ;;  %s2299_s17 = smov 8  }
  0x2f   : > { %1979 = dma.hbm_to_vmem [thread:$0]  (!%p2402_p11), %s2840_s1, 2048, %s2395_s15, [#allocation6], %s2298_s14, %s2298_s14, %s2299_s17  }
  0x30   : > { %s2134_s23 = scalar_lea.hbm %s2822_s3, 2048 }
  0x31   : > { %p2135_p2 = scmp.ne.s32.totalorder %s2822_s3, %s2134_s23  ;;  %p2141_p10 = scmp.lt.u32.totalorder %s2134_s23, %s2822_s3 }
  0x33   : > { %p2137_p1 = pnand %p2135_p2, %p2416_p13 }
  0x35   : > { %p2138_p6 = pneg %p2137_p1 }
  0x37   : > { %p2143_p3 = pnand %p2141_p10, %p2138_p6 }
  0x39   : > { %2146 = shalt.err (!%p2143_p3)
}
  0x3a   : > { %s2147_s15 = scalar_lea.vmem %s2406_s18, 2048  ;;  %p2155_p12 = scmp.lt.s32.totalorder %s2406_s18, %s2406_s18 }
  0x3b   : > { %p2148_p5 = scmp.ne.s32.totalorder %s2406_s18, %s2147_s15  ;;  %p2156_p0 = scmp.lt.s32.totalorder %s2147_s15, %s2147_s15 }
  0x3d   : > { %p2150_p7 = pnand %p2148_p5, %p2416_p13  ;;  %p2157_p2 = por %p2156_p0, %p2155_p12 }
  0x3f   : > { %p2151_p9 = pneg %p2150_p7 }
  0x41   : > { %p2158_p1 = pnand %p2157_p2, %p2151_p9 }
  0x43   : > { %2161 = shalt.err (!%p2158_p1)
}
  0x44   : > { %s2300_s14 = smov 64   ;;  %s2301_s12 = smov 4  }
  0x45   : > { %1982 = dma.hbm_to_vmem [thread:$0]  (!%p2402_p11), %s2822_s3, 2048, %s2406_s18, [#allocation6], %s2300_s14, %s2300_s14, %s2301_s12  }
  0x46   : > { %s2302_s20 = smov [#allocation8]   ;;  %s2464_s22 = sadd.s32 1, %s2294_s30  }
  0x47   : > { %s274_s21 = sshll.u32 %s2302_s20, 4  ;;  %s2162_s26 = scalar_lea.hbm %s2824_s5, 1024  ;;  %s275_s21 = int_to_ptr.vmem [resolvable:$true] %s274_s21 }
  0x48   : > { %p2163_p6 = scmp.ne.s32.totalorder %s2824_s5, %s2162_s26  ;;  %p2169_p5 = scmp.lt.u32.totalorder %s2162_s26, %s2824_s5 }
  0x4a   : > { %p2165_p10 = pnand %p2163_p6, %p2416_p13 }
  0x4c   : > { %p2166_p3 = pneg %p2165_p10 }
  0x4e   : > { %p2171_p7 = pnand %p2169_p5, %p2166_p3 }
  0x50   : > { %2174 = shalt.err (!%p2171_p7)
}
  0x51   : > { %s2175_s18 = scalar_lea.vmem %s275_s21, 1024  ;;  %p2183_p2 = scmp.lt.s32.totalorder %s275_s21, %s275_s21 }
  0x52   : > { %p2176_p9 = scmp.ne.s32.totalorder %s275_s21, %s2175_s18  ;;  %p2184_p1 = scmp.lt.s32.totalorder %s2175_s18, %s2175_s18 }
  0x54   : > { %p2178_p12 = pnand %p2176_p9, %p2416_p13  ;;  %p2185_p4 = por %p2184_p1, %p2183_p2 }
  0x56   : > { %p2179_p0 = pneg %p2178_p12 }
  0x58   : > { %p2186_p8 = pnand %p2185_p4, %p2179_p0 }
  0x5a   : > { %2189 = shalt.err (!%p2186_p8)
}
  0x5b   : > { %1985 = dma.hbm_to_vmem [thread:$0]  (!%p2402_p11), %s2824_s5, 1024, %s275_s21, [#allocation9], %s2300_s14, %s2300_s14, %s2301_s12  }
  0x5c   : > { %s30_s24 = ssub.s32 %s2294_s30, %s2464_s22  ;;  %s33_s16 = sadd.s32 1, %s2290_s29 }
  0x5d   : > { %p31_p4 = scmp.eq.s32.totalorder %s30_s24, 0  ;;  %p40_p8 = scmp.ne.s32.totalorder %s2290_s29, %s2286_s28 }
  0x5e   : > { %p41_p13 = scmp.eq.s32.totalorder %s2294_s30, 0  ;;  %p1997_p6 = scmp.lt.s32.totalorder %s2294_s30, 2 }
  0x5f   : > { %s2495_s17 = scalar_select %p31_p4, %s2290_s29, %s33_s16  }
  0x60   : > { %p42_p10 = por %p41_p13, %p40_p8  ;;  %p2842_p3 = scmp.eq.s32.totalorder %s2372_s9, 1 }
  0x61   : > { %s294_s20 = sand.u32 1, %s2290_s29   ;;  %s1756_s23 = sshll.u32 %s2294_s30, 11 }
  0x62   : > { %p2499_p5 = por %p2842_p3, %p40_p8  ;;  %s1684_s25 = sshll.u32 %s294_s20, 7 }
  0x63   : > { %s2508_s21 = scalar_lea.hbm %s2819_s0, %s1756_s23  ;;  %s298_s15 = scalar_lea.vmem [#allocation2], %s1684_s25 }
  0x64   : > { %s305_s18 = sshll.u32 %s298_s15, 4  ;;  %p2510_p11 = pnand %p1997_p6, %p42_p10  ;;  %s2514_s18 = int_to_ptr.vmem [resolvable:$true] %s305_s18 }
  0x65   : > { %s2516_s27 = scalar_lea.sflag [#allocation3], %s294_s20  ;;  %s2190_s24 = scalar_lea.hbm %s2508_s21, 2048 }
  0x66   : > { %p2191_p7 = scmp.ne.s32.totalorder %s2508_s21, %s2190_s24  ;;  %p2192_p9 = pneg %p2510_p11 }
  0x67   : > { %s2195_s25 = scalar_lea.hbm %s2819_s0, 4096  ;;  %p2196_p2 = scmp.lt.u32.totalorder %s2508_s21, %s2819_s0 }
  0x68   : > { %p2193_p12 = pnand %p2192_p9, %p2191_p7  ;;  %p2197_p1 = scmp.lt.u32.totalorder %s2195_s25, %s2190_s24 }
  0x69   : > { %p2199_p8 = scmp.lt.u32.totalorder %s2190_s24, %s2508_s21 }
  0x6a   : > { %p2194_p0 = pneg %p2193_p12  ;;  %p2198_p4 = por %p2197_p1, %p2196_p2 }
  0x6c   : > { %p2200_p13 = por %p2199_p8, %p2198_p4 }
  0x6e   : > { %p2201_p6 = pnand %p2200_p13, %p2194_p0 }
  0x70   : > { %2204 = shalt.err (!%p2201_p6)
}
  0x71   : > { %s2205_s20 = scalar_lea.vmem %s2514_s18, 2048  ;;  %s2303_s15 = smov [#allocation2]  }
  0x72   : > { %p2206_p10 = scmp.ne.s32.totalorder %s2514_s18, %s2205_s20  ;;  %s2210_s16 = sshll.u32 %s2303_s15, 4  ;;  %s2211_s16 = int_to_ptr.vmem [resolvable:$false] %s2210_s16 }
  0x73   : > { %s2212_s23 = scalar_lea.vmem %s2211_s16, 4096  ;;  %p2213_p12 = scmp.lt.s32.totalorder %s2514_s18, %s2211_s16 }
  0x74   : > { %p2208_p3 = pnand %p2206_p10, %p2192_p9  ;;  %p2214_p2 = scmp.lt.s32.totalorder %s2212_s23, %s2205_s20 }
  0x76   : > { %p2209_p7 = pneg %p2208_p3  ;;  %p2215_p1 = por %p2214_p2, %p2213_p12 }
  0x78   : > { %p2216_p4 = pnand %p2215_p1, %p2209_p7 }
  0x7a   : > { %2219 = shalt.err (!%p2216_p4)
}
  0x7b   : > { %1989 = dma.hbm_to_vmem [thread:$0]  (!%p2510_p11), %s2508_s21, 2048, %s2514_s18, %s2516_s27, %s2300_s14, %s2300_s14, %s2301_s12  }
  0x7c   : > { %p2845_p9 = scmp.ne.s32.totalorder %s2838_s13, 0 }
  0x7d   : > { %s2550_s24 = sand.u32 (!%p2845_p9), 1, %s2286_s28   ;;  %p2846_p0 = scmp.ne.s32.totalorder (!%p2845_p9), %s2835_s11, 0 }
  0x7e   : > { %317 = sbr.rel (%p2845_p9) target bundleno = 1204 (0x4b4), region = 52  ;;  %s1688_s25 = sshll.u32 (!%p2845_p9), %s2550_s24, 7 }
  0x7f   : > { %s320_s26 = scalar_lea.sflag (!%p2845_p9), [#allocation3], %s2550_s24  ;;  %s2554_s10 = scalar_lea.vmem (!%p2845_p9), [#allocation2], %s1688_s25 }
  0x85   : > { %2265 = dma.done.wait (%p2846_p0), %s320_s26, 2048  }
  0x86   : > { %2267 = vsyncadd (%p2846_p0), %s320_s26, 4294965248  ;;  %p2847_p11 = scmp.eq.s32.totalorder %s2372_s9, 0 }
  0x88   : > { %2269 = dma.done.wait (%p2847_p11), [#allocation6], 4096   ;;  %p2848_p8 = pmov %p2847_p11 }
  0x8a   : > { %2271 = vsyncadd (%p2848_p8), [#allocation6], 4294963200  ;;  %p2849_p13 = pmov %p2848_p8 }
  0x8b   : > { %p2850_p6 = pmov %p2848_p8 }
  0x8c   : > { %2273 = dma.done.wait (%p2849_p13), [#allocation9], 1024  }
  0x8d   : > { %2275 = vsyncadd (%p2850_p6), [#allocation9], 4294966272  ;;  %v2304_v0 = vmov 0   ;;  %v2042_v1 = vld [vmem:[#allocation5 + $0x4] ss:$8 sps:$4 sm:$0xff]   ;;  %v2086_v22 = vld [vmem:[#allocation7 + $0x50] sm:$0xff]   ;;  %v421_v49 = vlaneseq }
  0x8e   : > { %639 = vmatprep.mubr.bf16.mxu0 %v2304_v0  ;;  %v2044_v2 = vld [vmem:[#allocation5] ss:$8 sps:$4 sm:$0xff]   ;;  %607 = vmatprep.subr.bf16.mxu0 %v2042_v1  ;;  %v2045_v3 = vld [vmem:[#allocation5 + $0x14] ss:$8 sps:$4 sm:$0xff]   ;;  %v2047_v4 = vld [vmem:[#allocation5 + $0x10] ss:$8 sps:$4 sm:$0xff]  }
  0x8f   : > { %608 = vmatpush1.bf16.msra.mxu0 %v2044_v2  ;;  %v2048_v5 = vld [vmem:[#allocation5 + $0x24] ss:$8 sps:$4 sm:$0xff]   ;;  %v2050_v6 = vld [vmem:[#allocation5 + $0x20] ss:$8 sps:$4 sm:$0xff]   ;;  %v2051_v7 = vld [vmem:[#allocation5 + $0x34] ss:$8 sps:$4 sm:$0xff]  }
  0x90   : > { %609 = vmatprep.subr.bf16.mxu0 %v2045_v3  ;;  %v2053_v8 = vld [vmem:[#allocation5 + $0x30] ss:$8 sps:$4 sm:$0xff]   ;;  %v2054_v9 = vld [vmem:[#allocation5 + $0x44] ss:$8 sps:$4 sm:$0xff]   ;;  %v2056_v10 = vld [vmem:[#allocation5 + $0x40] ss:$8 sps:$4 sm:$0xff]  }
  0x91   : > { %v2057_v11 = vld [vmem:[#allocation5 + $0x54] ss:$8 sps:$4 sm:$0xff]   ;;  %v2059_v12 = vld [vmem:[#allocation5 + $0x50] ss:$8 sps:$4 sm:$0xff]   ;;  %v2060_v13 = vld [vmem:[#allocation5 + $0x64] ss:$8 sps:$4 sm:$0xff]  }
  0x92   : > { %v2062_v14 = vld [vmem:[#allocation5 + $0x60] ss:$8 sps:$4 sm:$0xff]   ;;  %v2063_v15 = vld [vmem:[#allocation5 + $0x74] ss:$8 sps:$4 sm:$0xff]   ;;  %v2065_v16 = vld [vmem:[#allocation5 + $0x70] ss:$8 sps:$4 sm:$0xff]  }
  0x93   : > { %610 = vmatpush1.bf16.msra.mxu0 %v2047_v4  ;;  %v2082_v17 = vld [vmem:[#allocation7 + $0x40] sm:$0xff]   ;;  %v2084_v20 = vld [vmem:[#allocation7 + $0x48] sm:$0xff]   ;;  %v2087_v23 = vld [vmem:[#allocation7 + $0x10] sm:$0xff]   ;;  %v422_v50 = vshrl.u32 %v421_v49, 7  ;;  %s1692_s20 = sshll.u32 %s2550_s24, 4  ;;  %s1757_s23 = sshll.u32 %s2372_s9, 8 }
  0x94   : > { %611 = vmatprep.subr.bf16.mxu0 %v2048_v5  ;;  %v2066_v18 = vld [vmem:[%s2554_s10] sm:$0xff]   ;;  %1758 = vmatprep.subr.bf16.mxu1 %v2082_v17  ;;  %v2085_v21 = vld [vmem:[#allocation7 + $0x8] sm:$0xff]   ;;  %v2088_v24 = vld [vmem:[#allocation7 + $0x58] sm:$0xff]   ;;  %s367_s15 = scalar_lea.vmem [#allocation10], %s1692_s20  ;;  %s1565_s11 = scalar_lea.sflag [#allocation4], %s2550_s24 }
  0x95   : > { %v2083_v19 = vld [vmem:[#allocation7] sm:$0xff]   ;;  %v2067_v25 = vld [vmem:[%s2554_s10 + $0x8] sm:$0xff]   ;;  %v2089_v26 = vld [vmem:[#allocation7 + $0x18] sm:$0xff]   ;;  %v423_v51 = vsub.s32 0, %v422_v50  ;;  %v427_v53 = vsub.s32 1, %v422_v50  ;;  %s1579_s16 = sshll.u32 %s367_s15, 4  ;;  %s2772_s16 = int_to_ptr.vmem [resolvable:$true] %s1579_s16 }
  0x96   : > { %1759 = vmatpush3.bf16.msra.mxu1 %v2083_v19  ;;  %v2090_v27 = vld [vmem:[#allocation7 + $0x60] sm:$0xff]   ;;  %v2092_v29 = vld [vmem:[#allocation7 + $0x68] sm:$0xff]   ;;  %v2068_v30 = vld [vmem:[%s2554_s10 + $0x10] sm:$0xff]   ;;  %s2220_s13 = scalar_lea.vmem %s2772_s16, 256  ;;  %s2305_s9 = smov [#allocation10]  }
  0x97   : > { %612 = vmatpush1.bf16.msra.mxu0 %v2050_v6  ;;  %1760 = vmatprep.subr.bf16.mxu1 %v2084_v20  ;;  %v2091_v28 = vld [vmem:[#allocation7 + $0x20] sm:$0xff]   ;;  %v2069_v31 = vld [vmem:[%s2554_s10 + $0x18] sm:$0xff]   ;;  %v2071_v33 = vld [vmem:[%s2554_s10 + $0x28] sm:$0xff]   ;;  %p2221_p10 = scmp.ne.s32.totalorder %s2772_s16, %s2220_s13  ;;  %s2224_s14 = sshll.u32 %s2305_s9, 4  ;;  %s2225_s14 = int_to_ptr.vmem [resolvable:$false] %s2224_s14 }
  0x98   : > { %613 = vmatprep.subr.bf16.mxu0 %v2051_v7  ;;  %v2070_v32 = vld [vmem:[%s2554_s10 + $0x20] sm:$0xff]   ;;  %v2072_v34 = vld [vmem:[%s2554_s10 + $0x30] sm:$0xff]   ;;  %v2073_v35 = vld [vmem:[%s2554_s10 + $0x38] sm:$0xff]   ;;  %s2226_s12 = scalar_lea.vmem %s2225_s14, 512  ;;  %p2227_p12 = scmp.lt.s32.totalorder %s2772_s16, %s2225_s14 }
  0x99   : > { %v2074_v36 = vld [vmem:[%s2554_s10 + $0x40] sm:$0xff]   ;;  %v2075_v37 = vld [vmem:[%s2554_s10 + $0x48] sm:$0xff]   ;;  %v2076_v38 = vld [vmem:[%s2554_s10 + $0x50] sm:$0xff]   ;;  %p2222_p3 = pnand %p2221_p10, %p2499_p5  ;;  %p2228_p2 = scmp.lt.s32.totalorder %s2226_s12, %s2220_s13 }
  0x9a   : > { %1761 = vmatpush3.bf16.msra.mxu1 %v2085_v21  ;;  %v2093_v39 = vld [vmem:[#allocation7 + $0x28] sm:$0xff]   ;;  %v2077_v40 = vld [vmem:[%s2554_s10 + $0x58] sm:$0xff]   ;;  %v2094_v41 = vld [vmem:[#allocation7 + $0x70] sm:$0xff]  }
  0x9b   : > { %614 = vmatpush1.bf16.msra.mxu0 %v2053_v8  ;;  %1762 = vmatprep.subr.bf16.mxu1 %v2086_v22  ;;  %v2095_v42 = vld [vmem:[#allocation7 + $0x30] sm:$0xff]   ;;  %v2096_v43 = vld [vmem:[#allocation7 + $0x78] sm:$0xff]   ;;  %v2078_v45 = vld [vmem:[%s2554_s10 + $0x60] sm:$0xff]   ;;  %p2223_p7 = pneg %p2222_p3  ;;  %p2229_p1 = por %p2228_p2, %p2227_p12 }
  0x9c   : > { %615 = vmatprep.subr.bf16.mxu0 %v2054_v9  ;;  %v2097_v44 = vld [vmem:[#allocation7 + $0x38] sm:$0xff]   ;;  %v2079_v46 = vld [vmem:[%s2554_s10 + $0x68] sm:$0xff]   ;;  %v2080_v47 = vld [vmem:[%s2554_s10 + $0x70] sm:$0xff]  }
  0x9d   : > { %v2081_v48 = vld [vmem:[%s2554_s10 + $0x78] sm:$0xff]   ;;  %v419_v52 = vld [vmem:[%s2821_s2] sm:$0x3]  ;;  %v2100_v7 = vld [vmem:[#allocation8 + $0x10] sm:$0xff]   ;;  %s2777_s10 = scalar_lea.hbm %s2827_s8, %s1757_s23  ;;  %p2230_p4 = pnand %p2229_p1, %p2223_p7 }
  0x9e   : > { %1763 = vmatpush3.bf16.msra.mxu1 %v2087_v23  ;;  %v2603_v54 = vrot.slane %v419_v52, %v423_v51  ;;  %v2605_v55 = vrot.slane %v419_v52, %v427_v53  ;;  %v2098_v63 = vld [vmem:[#allocation8] sm:$0xff]  }
  0x9f   : > { %616 = vmatpush1.bf16.msra.mxu0 %v2056_v10  ;;  %1764 = vmatprep.subr.bf16.mxu1 %v2088_v24 }
  0xa0   : > { %617 = vmatprep.subr.bf16.mxu0 %v2057_v11 }
  0xa2   : > { %1765 = vmatpush3.bf16.msra.mxu1 %v2089_v26 }
  0xa3   : > { %618 = vmatpush1.bf16.msra.mxu0 %v2059_v12  ;;  %1766 = vmatprep.subr.bf16.mxu1 %v2090_v27 }
  0xa4   : > { %619 = vmatprep.subr.bf16.mxu0 %v2060_v13 }
  0xa6   : > { %1767 = vmatpush3.bf16.msra.mxu1 %v2091_v28 }
  0xa7   : > { %620 = vmatpush1.bf16.msra.mxu0 %v2062_v14  ;;  %1768 = vmatprep.subr.bf16.mxu1 %v2092_v29 }
  0xa8   : > { %621 = vmatprep.subr.bf16.mxu0 %v2063_v15 }
  0xaa   : > { %1769 = vmatpush3.bf16.msra.mxu1 %v2093_v39 }
  0xab   : > { %622 = vmatpush1.bf16.msra.mxu0 %v2065_v16  ;;  %1770 = vmatprep.subr.bf16.mxu1 %v2094_v41 }
  0xac   : > { %1912 = vmatprep.subr.bf16.mxu0 %v2098_v63 }
  0xae   : > { %640 = vmatmul.mubr.bf16.vlgmr.msra.gmra.mrb[0].mxu0 %v2066_v18  ;;  %1771 = vmatpush3.bf16.msra.mxu1 %v2095_v42 }
  0xaf   : > { %649 = vmatprep.mubr.bf16.mxu0 %v2304_v0  ;;  %1772 = vmatprep.subr.bf16.mxu1 %v2096_v43 }
  0xb0   : > { %1913 = vmatpush3.bf16.msra.mxu0 %v2098_v63 }
  0xb2   : > { %1773 = vmatpush3.bf16.msra.mxu1 %v2097_v44 }
  0xb6   : > { %650 = vmatmul.mubr.bf16.gmra.mrb[4].mxu0 %v2067_v25 }
  0xb7   : > { %659 = vmatprep.mubr.bf16.mxu0 %v2304_v0 }
  0xbe   : > { %660 = vmatmul.mubr.bf16.gmra.mrb[8].mxu0 %v2068_v30 }
  0xbf   : > { %669 = vmatprep.mubr.bf16.mxu0 %v2304_v0 }
  0xc6   : > { %670 = vmatmul.mubr.bf16.gmra.mrb[12].mxu0 %v2069_v31 }
  0xc7   : > { %679 = vmatprep.mubr.bf16.mxu0 %v2304_v0 }
  0xce   : > { %680 = vmatmul.mubr.bf16.gmra.mrb[16].mxu0 %v2070_v32 }
  0xcf   : > { %689 = vmatprep.mubr.bf16.mxu0 %v2304_v0 }
  0xd6   : > { %690 = vmatmul.mubr.bf16.gmra.mrb[20].mxu0 %v2071_v33 }
  0xd7   : > { %699 = vmatprep.mubr.bf16.mxu0 %v2304_v0 }
  0xde   : > { %700 = vmatmul.mubr.bf16.gmra.mrb[24].mxu0 %v2072_v34 }
  0xdf   : > { %709 = vmatprep.mubr.bf16.mxu0 %v2304_v0 }
  0xe6   : > { %710 = vmatmul.mubr.bf16.gmra.mrb[28].mxu0 %v2073_v35 }
  0xe7   : > { %719 = vmatprep.mubr.bf16.mxu0 %v2304_v0 }
  0xee   : > { %720 = vmatmul.mubr.bf16.gmra.mrb[32].mxu0 %v2074_v36 }
  0xef   : > { %729 = vmatprep.mubr.bf16.mxu0 %v2304_v0 }
  0xf6   : > { %730 = vmatmul.mubr.bf16.gmra.mrb[36].mxu0 %v2075_v37 }
  0xf7   : > { %739 = vmatprep.mubr.bf16.mxu0 %v2304_v0 }
  0xfe   : > { %740 = vmatmul.mubr.bf16.gmra.mrb[40].mxu0 %v2076_v38 }
  0xff   : > { %749 = vmatprep.mubr.bf16.mxu0 %v2304_v0 }
 0x106   : > { %750 = vmatmul.mubr.bf16.gmra.mrb[44].mxu0 %v2077_v40 }
 0x107   : > { %759 = vmatprep.mubr.bf16.mxu0 %v2304_v0 }
 0x10e   : > { %760 = vmatmul.mubr.bf16.gmra.mrb[48].mxu0 %v2078_v45 }
 0x10f   : > { %769 = vmatprep.mubr.bf16.mxu0 %v2304_v0 }
 0x116   : > { %770 = vmatmul.mubr.bf16.gmra.mrb[52].mxu0 %v2079_v46 }
 0x117   : > { %779 = vmatprep.mubr.bf16.mxu0 %v2304_v0 }
 0x11e   : > { %780 = vmatmul.mubr.bf16.gmra.mrb[56].mxu0 %v2080_v47 }
 0x11f   : > { %789 = vmatprep.mubr.bf16.mxu0 %v2304_v0  ;;  %v2099_v0 = vld [vmem:[#allocation8 + $0x8] sm:$0xff]  }
 0x120   : > { %1914 = vmatprep.subr.bf16.mxu0 %v2099_v0 }
 0x121   : > { %1915 = vmatpush3.bf16.msra.mxu0 %v2099_v0 }
 0x122   : > { %1916 = vmatprep.subr.bf16.mxu0 %v2100_v7 }
 0x125   : > { %1917 = vmatpush3.bf16.msra.mxu0 %v2100_v7 }
 0x126   : > { %790 = vmatmul.mubr.bf16.gmra.mrb[60].mxu0 %v2081_v48 }
 0x181   : > { %v641_v56 = vpop.f32.mrb[0].mxu0 }
 0x182   : > { %v642_v57 = vadd.f32 %v641_v56, %v2603_v54  ;;  %v643_v58 = vpop.f32.mrb[1].mxu0 }
 0x183   : > { %v644_v59 = vadd.f32 %v643_v58, %v2605_v55  ;;  %v645_v60 = vpop.f32.mrb[2].mxu0 }
 0x184   : > { %v646_v61 = vadd.f32 %v645_v60, %v2603_v54  ;;  %v647_v62 = vpop.f32.mrb[3].mxu0  ;;  %v800_v2 = vmax.f32 %v642_v57, 0.0 }
 0x185   : > { %v648_v1 = vadd.f32 %v647_v62, %v2605_v55  ;;  %v801_v4 = vmax.f32 %v644_v59, 0.0 }
 0x186   : > { %v802_v3 = vmax.f32 %v646_v61, 0.0 }
 0x187   : > { %v803_v5 = vmax.f32 %v648_v1, 0.0 }
 0x188   : > { %v864_v6 = vpack.c.bf16 %v802_v3, %v800_v2 }
 0x189   : > { %v651_v8 = vpop.f32.mrb[4].mxu0  ;;  %v865_v9 = vpack.c.bf16 %v803_v5, %v801_v4 }
 0x18a   : > { %v652_v10 = vadd.f32 %v651_v8, %v2603_v54  ;;  %v653_v11 = vpop.f32.mrb[5].mxu0 }
 0x18b   : > { %v654_v12 = vadd.f32 %v653_v11, %v2605_v55  ;;  %v655_v13 = vpop.f32.mrb[6].mxu0  ;;  %1063 = vmatprep.mubr.bf16.mxu1 %v865_v9 }
 0x18c   : > { %v656_v14 = vadd.f32 %v655_v13, %v2603_v54  ;;  %v657_v15 = vpop.f32.mrb[7].mxu0  ;;  %1064 = vmatmul.mubr.bf16.vlgmr.msra.gmra.mrb[0].mxu1 %v864_v6  ;;  %v804_v17 = vmax.f32 %v652_v10, 0.0 }
 0x18d   : > { %v658_v16 = vadd.f32 %v657_v15, %v2605_v55  ;;  %v805_v19 = vmax.f32 %v654_v12, 0.0 }
 0x18e   : > { %v806_v18 = vmax.f32 %v656_v14, 0.0 }
 0x18f   : > { %v807_v20 = vmax.f32 %v658_v16, 0.0 }
 0x190   : > { %v866_v21 = vpack.c.bf16 %v806_v18, %v804_v17 }
 0x191   : > { %v867_v22 = vpack.c.bf16 %v807_v20, %v805_v19  ;;  %v661_v23 = vpop.f32.mrb[8].mxu0 }
 0x192   : > { %v662_v24 = vadd.f32 %v661_v23, %v2603_v54  ;;  %v663_v25 = vpop.f32.mrb[9].mxu0 }
 0x193   : > { %v664_v26 = vadd.f32 %v663_v25, %v2605_v55  ;;  %v665_v27 = vpop.f32.mrb[10].mxu0  ;;  %1071 = vmatprep.mubr.bf16.mxu1 %v867_v22 }
 0x194   : > { %v666_v28 = vadd.f32 %v665_v27, %v2603_v54  ;;  %v667_v29 = vpop.f32.mrb[11].mxu0  ;;  %1072 = vmatmul.mubr.bf16.gmra.mrb[4].mxu1 %v866_v21  ;;  %v808_v31 = vmax.f32 %v662_v24, 0.0 }
 0x195   : > { %v668_v30 = vadd.f32 %v667_v29, %v2605_v55  ;;  %v809_v33 = vmax.f32 %v664_v26, 0.0 }
 0x196   : > { %v810_v32 = vmax.f32 %v666_v28, 0.0 }
 0x197   : > { %v811_v34 = vmax.f32 %v668_v30, 0.0 }
 0x198   : > { %v868_v35 = vpack.c.bf16 %v810_v32, %v808_v31 }
 0x199   : > { %v869_v36 = vpack.c.bf16 %v811_v34, %v809_v33  ;;  %v671_v37 = vpop.f32.mrb[12].mxu0 }
 0x19a   : > { %v672_v38 = vadd.f32 %v671_v37, %v2603_v54  ;;  %v673_v39 = vpop.f32.mrb[13].mxu0 }
 0x19b   : > { %v674_v40 = vadd.f32 %v673_v39, %v2605_v55  ;;  %v675_v41 = vpop.f32.mrb[14].mxu0  ;;  %1079 = vmatprep.mubr.bf16.mxu1 %v869_v36 }
 0x19c   : > { %v676_v42 = vadd.f32 %v675_v41, %v2603_v54  ;;  %v677_v43 = vpop.f32.mrb[15].mxu0  ;;  %1080 = vmatmul.mubr.bf16.gmra.mrb[8].mxu1 %v868_v35  ;;  %v812_v45 = vmax.f32 %v672_v38, 0.0 }
 0x19d   : > { %v678_v44 = vadd.f32 %v677_v43, %v2605_v55  ;;  %v813_v47 = vmax.f32 %v674_v40, 0.0 }
 0x19e   : > { %v814_v46 = vmax.f32 %v676_v42, 0.0 }
 0x19f   : > { %v815_v48 = vmax.f32 %v678_v44, 0.0 }
 0x1a0   : > { %v870_v49 = vpack.c.bf16 %v814_v46, %v812_v45 }
 0x1a1   : > { %v871_v50 = vpack.c.bf16 %v815_v48, %v813_v47  ;;  %v681_v51 = vpop.f32.mrb[16].mxu0 }
 0x1a2   : > { %v682_v52 = vadd.f32 %v681_v51, %v2603_v54  ;;  %v683_v53 = vpop.f32.mrb[17].mxu0 }
 0x1a3   : > { %v684_v56 = vadd.f32 %v683_v53, %v2605_v55  ;;  %v685_v57 = vpop.f32.mrb[18].mxu0  ;;  %1087 = vmatprep.mubr.bf16.mxu1 %v871_v50 }
 0x1a4   : > { %v686_v58 = vadd.f32 %v685_v57, %v2603_v54  ;;  %v687_v59 = vpop.f32.mrb[19].mxu0  ;;  %1088 = vmatmul.mubr.bf16.gmra.mrb[12].mxu1 %v870_v49  ;;  %v816_v61 = vmax.f32 %v682_v52, 0.0 }
 0x1a5   : > { %v688_v60 = vadd.f32 %v687_v59, %v2605_v55  ;;  %v817_v63 = vmax.f32 %v684_v56, 0.0 }
 0x1a6   : > { %v818_v62 = vmax.f32 %v686_v58, 0.0 }
 0x1a7   : > { %v819_v0 = vmax.f32 %v688_v60, 0.0 }
 0x1a8   : > { %v872_v1 = vpack.c.bf16 %v818_v62, %v816_v61 }
 0x1a9   : > { %v873_v2 = vpack.c.bf16 %v819_v0, %v817_v63  ;;  %v691_v3 = vpop.f32.mrb[20].mxu0 }
 0x1aa   : > { %v692_v4 = vadd.f32 %v691_v3, %v2603_v54  ;;  %v693_v5 = vpop.f32.mrb[21].mxu0 }
 0x1ab   : > { %v694_v6 = vadd.f32 %v693_v5, %v2605_v55  ;;  %v695_v7 = vpop.f32.mrb[22].mxu0  ;;  %1095 = vmatprep.mubr.bf16.mxu1 %v873_v2 }
 0x1ac   : > { %v696_v8 = vadd.f32 %v695_v7, %v2603_v54  ;;  %v697_v9 = vpop.f32.mrb[23].mxu0  ;;  %1096 = vmatmul.mubr.bf16.gmra.mrb[16].mxu1 %v872_v1  ;;  %v820_v11 = vmax.f32 %v692_v4, 0.0 }
 0x1ad   : > { %v698_v10 = vadd.f32 %v697_v9, %v2605_v55  ;;  %v821_v13 = vmax.f32 %v694_v6, 0.0 }
 0x1ae   : > { %v822_v12 = vmax.f32 %v696_v8, 0.0 }
 0x1af   : > { %v823_v14 = vmax.f32 %v698_v10, 0.0 }
 0x1b0   : > { %v874_v15 = vpack.c.bf16 %v822_v12, %v820_v11 }
 0x1b1   : > { %v875_v16 = vpack.c.bf16 %v823_v14, %v821_v13  ;;  %v701_v17 = vpop.f32.mrb[24].mxu0 }
 0x1b2   : > { %v702_v18 = vadd.f32 %v701_v17, %v2603_v54  ;;  %v703_v19 = vpop.f32.mrb[25].mxu0 }
 0x1b3   : > { %v704_v20 = vadd.f32 %v703_v19, %v2605_v55  ;;  %v705_v21 = vpop.f32.mrb[26].mxu0  ;;  %1103 = vmatprep.mubr.bf16.mxu1 %v875_v16 }
 0x1b4   : > { %v706_v22 = vadd.f32 %v705_v21, %v2603_v54  ;;  %v707_v23 = vpop.f32.mrb[27].mxu0  ;;  %1104 = vmatmul.mubr.bf16.gmra.mrb[20].mxu1 %v874_v15  ;;  %v824_v25 = vmax.f32 %v702_v18, 0.0 }
 0x1b5   : > { %v708_v24 = vadd.f32 %v707_v23, %v2605_v55  ;;  %v825_v27 = vmax.f32 %v704_v20, 0.0 }
 0x1b6   : > { %v826_v26 = vmax.f32 %v706_v22, 0.0 }
 0x1b7   : > { %v827_v28 = vmax.f32 %v708_v24, 0.0 }
 0x1b8   : > { %v876_v29 = vpack.c.bf16 %v826_v26, %v824_v25 }
 0x1b9   : > { %v877_v30 = vpack.c.bf16 %v827_v28, %v825_v27  ;;  %v711_v31 = vpop.f32.mrb[28].mxu0 }
 0x1ba   : > { %v712_v32 = vadd.f32 %v711_v31, %v2603_v54  ;;  %v713_v33 = vpop.f32.mrb[29].mxu0 }
 0x1bb   : > { %v714_v34 = vadd.f32 %v713_v33, %v2605_v55  ;;  %v715_v35 = vpop.f32.mrb[30].mxu0  ;;  %1111 = vmatprep.mubr.bf16.mxu1 %v877_v30  ;;  %v2101_v33 = vld [vmem:[#allocation8 + $0x18] sm:$0xff]  }
 0x1bc   : > { %v716_v36 = vadd.f32 %v715_v35, %v2603_v54  ;;  %v717_v37 = vpop.f32.mrb[31].mxu0  ;;  %1112 = vmatmul.mubr.bf16.gmra.mrb[24].mxu1 %v876_v29  ;;  %v828_v39 = vmax.f32 %v712_v32, 0.0  ;;  %1918 = vmatprep.subr.bf16.mxu0 %v2101_v33 }
 0x1bd   : > { %v718_v38 = vadd.f32 %v717_v37, %v2605_v55  ;;  %v829_v41 = vmax.f32 %v714_v34, 0.0  ;;  %1919 = vmatpush3.bf16.msra.mxu0 %v2101_v33 }
 0x1be   : > { %v830_v40 = vmax.f32 %v716_v36, 0.0 }
 0x1bf   : > { %v831_v42 = vmax.f32 %v718_v38, 0.0 }
 0x1c0   : > { %v878_v43 = vpack.c.bf16 %v830_v40, %v828_v39 }
 0x1c1   : > { %v879_v44 = vpack.c.bf16 %v831_v42, %v829_v41  ;;  %v721_v45 = vpop.f32.mrb[32].mxu0  ;;  %v2102_v41 = vld [vmem:[#allocation8 + $0x20] sm:$0xff]  }
 0x1c2   : > { %v722_v46 = vadd.f32 %v721_v45, %v2603_v54  ;;  %v723_v47 = vpop.f32.mrb[33].mxu0  ;;  %1920 = vmatprep.subr.bf16.mxu0 %v2102_v41 }
 0x1c3   : > { %v724_v48 = vadd.f32 %v723_v47, %v2605_v55  ;;  %v725_v49 = vpop.f32.mrb[34].mxu0  ;;  %1119 = vmatprep.mubr.bf16.mxu1 %v879_v44  ;;  %1921 = vmatpush3.bf16.msra.mxu0 %v2102_v41 }
 0x1c4   : > { %v726_v50 = vadd.f32 %v725_v49, %v2603_v54  ;;  %v727_v51 = vpop.f32.mrb[35].mxu0  ;;  %1120 = vmatmul.mubr.bf16.gmra.mrb[28].mxu1 %v878_v43  ;;  %v832_v53 = vmax.f32 %v722_v46, 0.0  ;;  %v2103_v49 = vld [vmem:[#allocation8 + $0x28] sm:$0xff]  }
 0x1c5   : > { %v728_v52 = vadd.f32 %v727_v51, %v2605_v55  ;;  %v833_v57 = vmax.f32 %v724_v48, 0.0  ;;  %1922 = vmatprep.subr.bf16.mxu0 %v2103_v49 }
 0x1c6   : > { %v834_v56 = vmax.f32 %v726_v50, 0.0 }
 0x1c7   : > { %v835_v58 = vmax.f32 %v728_v52, 0.0  ;;  %1923 = vmatpush3.bf16.msra.mxu0 %v2103_v49 }
 0x1c8   : > { %v880_v59 = vpack.c.bf16 %v834_v56, %v832_v53 }
 0x1c9   : > { %v881_v60 = vpack.c.bf16 %v835_v58, %v833_v57  ;;  %v731_v61 = vpop.f32.mrb[36].mxu0 }
 0x1ca   : > { %v732_v62 = vadd.f32 %v731_v61, %v2603_v54  ;;  %v733_v63 = vpop.f32.mrb[37].mxu0 }
 0x1cb   : > { %v734_v0 = vadd.f32 %v733_v63, %v2605_v55  ;;  %v735_v1 = vpop.f32.mrb[38].mxu0  ;;  %1127 = vmatprep.mubr.bf16.mxu1 %v881_v60 }
 0x1cc   : > { %v736_v2 = vadd.f32 %v735_v1, %v2603_v54  ;;  %v737_v3 = vpop.f32.mrb[39].mxu0  ;;  %1128 = vmatmul.mubr.bf16.gmra.mrb[32].mxu1 %v880_v59  ;;  %v836_v5 = vmax.f32 %v732_v62, 0.0  ;;  %v2104_v59 = vld [vmem:[#allocation8 + $0x30] sm:$0xff]  }
 0x1cd   : > { %v738_v4 = vadd.f32 %v737_v3, %v2605_v55  ;;  %v837_v7 = vmax.f32 %v734_v0, 0.0  ;;  %1924 = vmatprep.subr.bf16.mxu0 %v2104_v59  ;;  %v2105_v3 = vld [vmem:[#allocation8 + $0x38] sm:$0xff]  }
 0x1ce   : > { %v838_v6 = vmax.f32 %v736_v2, 0.0  ;;  %1925 = vmatpush3.bf16.msra.mxu0 %v2104_v59 }
 0x1cf   : > { %v839_v8 = vmax.f32 %v738_v4, 0.0  ;;  %1926 = vmatprep.subr.bf16.mxu0 %v2105_v3 }
 0x1d0   : > { %v882_v9 = vpack.c.bf16 %v838_v6, %v836_v5 }
 0x1d1   : > { %v883_v10 = vpack.c.bf16 %v839_v8, %v837_v7  ;;  %v741_v11 = vpop.f32.mrb[40].mxu0 }
 0x1d2   : > { %v742_v12 = vadd.f32 %v741_v11, %v2603_v54  ;;  %v743_v13 = vpop.f32.mrb[41].mxu0  ;;  %1927 = vmatpush3.bf16.msra.mxu0 %v2105_v3 }
 0x1d3   : > { %v744_v14 = vadd.f32 %v743_v13, %v2605_v55  ;;  %v745_v15 = vpop.f32.mrb[42].mxu0  ;;  %1135 = vmatprep.mubr.bf16.mxu1 %v883_v10 }
 0x1d4   : > { %v746_v16 = vadd.f32 %v745_v15, %v2603_v54  ;;  %v747_v17 = vpop.f32.mrb[43].mxu0  ;;  %1136 = vmatmul.mubr.bf16.gmra.mrb[36].mxu1 %v882_v9  ;;  %v840_v19 = vmax.f32 %v742_v12, 0.0 }
 0x1d5   : > { %v748_v18 = vadd.f32 %v747_v17, %v2605_v55  ;;  %v841_v21 = vmax.f32 %v744_v14, 0.0 }
 0x1d6   : > { %v842_v20 = vmax.f32 %v746_v16, 0.0 }
 0x1d7   : > { %v843_v22 = vmax.f32 %v748_v18, 0.0 }
 0x1d8   : > { %v884_v23 = vpack.c.bf16 %v842_v20, %v840_v19 }
 0x1d9   : > { %v885_v24 = vpack.c.bf16 %v843_v22, %v841_v21  ;;  %v751_v25 = vpop.f32.mrb[44].mxu0 }
 0x1da   : > { %v752_v26 = vadd.f32 %v751_v25, %v2603_v54  ;;  %v753_v27 = vpop.f32.mrb[45].mxu0 }
 0x1db   : > { %v754_v28 = vadd.f32 %v753_v27, %v2605_v55  ;;  %v755_v29 = vpop.f32.mrb[46].mxu0  ;;  %1143 = vmatprep.mubr.bf16.mxu1 %v885_v24 }
 0x1dc   : > { %v756_v30 = vadd.f32 %v755_v29, %v2603_v54  ;;  %v757_v31 = vpop.f32.mrb[47].mxu0  ;;  %1144 = vmatmul.mubr.bf16.gmra.mrb[40].mxu1 %v884_v23  ;;  %v844_v34 = vmax.f32 %v752_v26, 0.0 }
 0x1dd   : > { %v758_v32 = vadd.f32 %v757_v31, %v2605_v55  ;;  %v845_v36 = vmax.f32 %v754_v28, 0.0 }
 0x1de   : > { %v846_v35 = vmax.f32 %v756_v30, 0.0 }
 0x1df   : > { %v847_v37 = vmax.f32 %v758_v32, 0.0 }
 0x1e0   : > { %v886_v38 = vpack.c.bf16 %v846_v35, %v844_v34 }
 0x1e1   : > { %v887_v39 = vpack.c.bf16 %v847_v37, %v845_v36  ;;  %v761_v40 = vpop.f32.mrb[48].mxu0 }
 0x1e2   : > { %v762_v42 = vadd.f32 %v761_v40, %v2603_v54  ;;  %v763_v43 = vpop.f32.mrb[49].mxu0 }
 0x1e3   : > { %v764_v44 = vadd.f32 %v763_v43, %v2605_v55  ;;  %v765_v45 = vpop.f32.mrb[50].mxu0  ;;  %1151 = vmatprep.mubr.bf16.mxu1 %v887_v39  ;;  %v2674_v39 = vld [vmem:[%s2823_s4] ss:$0 sm:$0xff] }
 0x1e4   : > { %v766_v46 = vadd.f32 %v765_v45, %v2603_v54  ;;  %v767_v47 = vpop.f32.mrb[51].mxu0  ;;  %1152 = vmatmul.mubr.bf16.gmra.mrb[44].mxu1 %v886_v38  ;;  %v848_v50 = vmax.f32 %v762_v42, 0.0 }
 0x1e5   : > { %v768_v48 = vadd.f32 %v767_v47, %v2605_v55  ;;  %v849_v52 = vmax.f32 %v764_v44, 0.0 }
 0x1e6   : > { %v850_v51 = vmax.f32 %v766_v46, 0.0 }
 0x1e7   : > { %v851_v53 = vmax.f32 %v768_v48, 0.0 }
 0x1e8   : > { %v888_v56 = vpack.c.bf16 %v850_v51, %v848_v50 }
 0x1e9   : > { %v889_v57 = vpack.c.bf16 %v851_v53, %v849_v52  ;;  %v771_v58 = vpop.f32.mrb[52].mxu0 }
 0x1ea   : > { %v772_v60 = vadd.f32 %v771_v58, %v2603_v54  ;;  %v773_v61 = vpop.f32.mrb[53].mxu0 }
 0x1eb   : > { %v774_v62 = vadd.f32 %v773_v61, %v2605_v55  ;;  %v775_v63 = vpop.f32.mrb[54].mxu0  ;;  %1159 = vmatprep.mubr.bf16.mxu1 %v889_v57 }
 0x1ec   : > { %v776_v0 = vadd.f32 %v775_v63, %v2603_v54  ;;  %v777_v1 = vpop.f32.mrb[55].mxu0  ;;  %1160 = vmatmul.mubr.bf16.gmra.mrb[48].mxu1 %v888_v56  ;;  %v852_v4 = vmax.f32 %v772_v60, 0.0 }
 0x1ed   : > { %v778_v2 = vadd.f32 %v777_v1, %v2605_v55  ;;  %v853_v6 = vmax.f32 %v774_v62, 0.0 }
 0x1ee   : > { %v854_v5 = vmax.f32 %v776_v0, 0.0 }
 0x1ef   : > { %v855_v7 = vmax.f32 %v778_v2, 0.0 }
 0x1f0   : > { %v890_v8 = vpack.c.bf16 %v854_v5, %v852_v4 }
 0x1f1   : > { %v891_v9 = vpack.c.bf16 %v855_v7, %v853_v6  ;;  %v781_v10 = vpop.f32.mrb[56].mxu0 }
 0x1f2   : > { %v782_v11 = vadd.f32 %v781_v10, %v2603_v54  ;;  %v783_v12 = vpop.f32.mrb[57].mxu0 }
 0x1f3   : > { %v784_v13 = vadd.f32 %v783_v12, %v2605_v55  ;;  %v785_v14 = vpop.f32.mrb[58].mxu0  ;;  %1167 = vmatprep.mubr.bf16.mxu1 %v891_v9 }
 0x1f4   : > { %v786_v15 = vadd.f32 %v785_v14, %v2603_v54  ;;  %v787_v16 = vpop.f32.mrb[59].mxu0  ;;  %1168 = vmatmul.mubr.bf16.gmra.mrb[52].mxu1 %v890_v8  ;;  %v856_v18 = vmax.f32 %v782_v11, 0.0 }
 0x1f5   : > { %v788_v17 = vadd.f32 %v787_v16, %v2605_v55  ;;  %v857_v20 = vmax.f32 %v784_v13, 0.0 }
 0x1f6   : > { %v858_v19 = vmax.f32 %v786_v15, 0.0 }
 0x1f7   : > { %v859_v21 = vmax.f32 %v788_v17, 0.0 }
 0x1f8   : > { %v892_v22 = vpack.c.bf16 %v858_v19, %v856_v18 }
 0x1f9   : > { %v893_v23 = vpack.c.bf16 %v859_v21, %v857_v20  ;;  %v791_v24 = vpop.f32.mrb[60].mxu0 }
 0x1fa   : > { %v792_v25 = vadd.f32 %v791_v24, %v2603_v54  ;;  %v793_v26 = vpop.f32.mrb[61].mxu0 }
 0x1fb   : > { %v794_v27 = vadd.f32 %v793_v26, %v2605_v55  ;;  %v795_v28 = vpop.f32.mrb[62].mxu0  ;;  %1175 = vmatprep.mubr.bf16.mxu1 %v893_v23 }
 0x1fc   : > { %v796_v29 = vadd.f32 %v795_v28, %v2603_v54  ;;  %v797_v30 = vpop.f32.mrb[63].mxu0  ;;  %1176 = vmatmul.mubr.bf16.gmra.mrb[56].mxu1 %v892_v22  ;;  %v860_v32 = vmax.f32 %v792_v25, 0.0 }
 0x1fd   : > { %v798_v31 = vadd.f32 %v797_v30, %v2605_v55  ;;  %v861_v34 = vmax.f32 %v794_v27, 0.0 }
 0x1fe   : > { %v862_v33 = vmax.f32 %v796_v29, 0.0 }
 0x1ff   : > { %v863_v35 = vmax.f32 %v798_v31, 0.0 }
 0x200   : > { %v894_v36 = vpack.c.bf16 %v862_v33, %v860_v32 }
 0x201   : > { %v895_v37 = vpack.c.bf16 %v863_v35, %v861_v34 }
 0x203   : > { %1183 = vmatprep.mubr.bf16.mxu1 %v895_v37 }
 0x204   : > { %1184 = vmatmul.mubr.bf16.gmra.mrb[60].mxu1 %v894_v36 }
 0x25f   : > { %v1774_v38 = vpop.f32.mrb[0].mxu1 }
 0x260   : > { %v1775_v40 = vpop.f32.mrb[1].mxu1 }
 0x261   : > { %v1776_v54 = vadd.f32 %v1775_v40, %v1774_v38  ;;  %v1777_v41 = vpop.f32.mrb[2].mxu1 }
 0x262   : > { %v1778_v42 = vpop.f32.mrb[3].mxu1 }
 0x263   : > { %v1066_v55 = vadd.f32 %v1776_v54, %v2674_v39  ;;  %v1779_v43 = vadd.f32 %v1778_v42, %v1777_v41 }
 0x265   : > { %v1069_v44 = vadd.f32 %v1779_v43, %v2674_v39  ;;  %v1192_v45 = vmax.f32 %v1066_v55, 0.0 }
 0x267   : > { %v1193_v46 = vmax.f32 %v1069_v44, 0.0  ;;  %v1780_v47 = vpop.f32.mrb[4].mxu1 }
 0x268   : > { %v1781_v48 = vpop.f32.mrb[5].mxu1 }
 0x269   : > { %v1782_v49 = vadd.f32 %v1781_v48, %v1780_v47  ;;  %v1783_v50 = vpop.f32.mrb[6].mxu1  ;;  %v1224_v51 = vpack.c.bf16 %v1193_v46, %v1192_v45 }
 0x26a   : > { %v1784_v52 = vpop.f32.mrb[7].mxu1 }
 0x26b   : > { %v1074_v53 = vadd.f32 %v1782_v49, %v2674_v39  ;;  %v1785_v56 = vadd.f32 %v1784_v52, %v1783_v50  ;;  %1928 = vmatprep.mubr.bf16.mxu0 %v1224_v51 }
 0x26d   : > { %v1077_v57 = vadd.f32 %v1785_v56, %v2674_v39  ;;  %v1194_v58 = vmax.f32 %v1074_v53, 0.0 }
 0x26f   : > { %v1195_v59 = vmax.f32 %v1077_v57, 0.0  ;;  %v1786_v60 = vpop.f32.mrb[8].mxu1 }
 0x270   : > { %v1787_v61 = vpop.f32.mrb[9].mxu1 }
 0x271   : > { %v1225_v62 = vpack.c.bf16 %v1195_v59, %v1194_v58  ;;  %v1788_v63 = vadd.f32 %v1787_v61, %v1786_v60  ;;  %v1789_v0 = vpop.f32.mrb[10].mxu1 }
 0x272   : > { %v1790_v1 = vpop.f32.mrb[11].mxu1 }
 0x273   : > { %v1082_v2 = vadd.f32 %v1788_v63, %v2674_v39  ;;  %v1791_v3 = vadd.f32 %v1790_v1, %v1789_v0  ;;  %1929 = vmatmul.mubr.bf16.vlgmr.msra.gmra.mrb[64].mxu0 %v1225_v62 }
 0x275   : > { %v1085_v4 = vadd.f32 %v1791_v3, %v2674_v39  ;;  %v1196_v5 = vmax.f32 %v1082_v2, 0.0 }
 0x277   : > { %v1197_v6 = vmax.f32 %v1085_v4, 0.0  ;;  %v1792_v7 = vpop.f32.mrb[12].mxu1 }
 0x278   : > { %v1793_v8 = vpop.f32.mrb[13].mxu1 }
 0x279   : > { %v1794_v9 = vadd.f32 %v1793_v8, %v1792_v7  ;;  %v1795_v10 = vpop.f32.mrb[14].mxu1  ;;  %v1226_v11 = vpack.c.bf16 %v1197_v6, %v1196_v5 }
 0x27a   : > { %v1796_v12 = vpop.f32.mrb[15].mxu1 }
 0x27b   : > { %v1090_v13 = vadd.f32 %v1794_v9, %v2674_v39  ;;  %v1797_v14 = vadd.f32 %v1796_v12, %v1795_v10  ;;  %1932 = vmatprep.mubr.bf16.mxu0 %v1226_v11 }
 0x27d   : > { %v1093_v15 = vadd.f32 %v1797_v14, %v2674_v39  ;;  %v1198_v16 = vmax.f32 %v1090_v13, 0.0 }
 0x27f   : > { %v1199_v17 = vmax.f32 %v1093_v15, 0.0  ;;  %v1798_v18 = vpop.f32.mrb[16].mxu1 }
 0x280   : > { %v1799_v19 = vpop.f32.mrb[17].mxu1 }
 0x281   : > { %v1800_v20 = vadd.f32 %v1799_v19, %v1798_v18  ;;  %v1801_v21 = vpop.f32.mrb[18].mxu1  ;;  %v1227_v22 = vpack.c.bf16 %v1199_v17, %v1198_v16 }
 0x282   : > { %v1802_v23 = vpop.f32.mrb[19].mxu1 }
 0x283   : > { %v1098_v24 = vadd.f32 %v1800_v20, %v2674_v39  ;;  %v1803_v25 = vadd.f32 %v1802_v23, %v1801_v21  ;;  %1933 = vmatmul.mubr.bf16.gmra.mrb[68].mxu0 %v1227_v22 }
 0x285   : > { %v1101_v26 = vadd.f32 %v1803_v25, %v2674_v39  ;;  %v1200_v27 = vmax.f32 %v1098_v24, 0.0 }
 0x287   : > { %v1201_v28 = vmax.f32 %v1101_v26, 0.0  ;;  %v1804_v29 = vpop.f32.mrb[20].mxu1 }
 0x288   : > { %v1805_v30 = vpop.f32.mrb[21].mxu1 }
 0x289   : > { %v1806_v31 = vadd.f32 %v1805_v30, %v1804_v29  ;;  %v1807_v32 = vpop.f32.mrb[22].mxu1  ;;  %v1228_v33 = vpack.c.bf16 %v1201_v28, %v1200_v27 }
 0x28a   : > { %v1808_v34 = vpop.f32.mrb[23].mxu1 }
 0x28b   : > { %v1106_v35 = vadd.f32 %v1806_v31, %v2674_v39  ;;  %v1809_v36 = vadd.f32 %v1808_v34, %v1807_v32  ;;  %1936 = vmatprep.mubr.bf16.mxu0 %v1228_v33 }
 0x28d   : > { %v1109_v37 = vadd.f32 %v1809_v36, %v2674_v39  ;;  %v1202_v38 = vmax.f32 %v1106_v35, 0.0 }
 0x28f   : > { %v1203_v40 = vmax.f32 %v1109_v37, 0.0  ;;  %v1810_v54 = vpop.f32.mrb[24].mxu1 }
 0x290   : > { %v1811_v41 = vpop.f32.mrb[25].mxu1 }
 0x291   : > { %v1812_v42 = vadd.f32 %v1811_v41, %v1810_v54  ;;  %v1813_v55 = vpop.f32.mrb[26].mxu1  ;;  %v1229_v43 = vpack.c.bf16 %v1203_v40, %v1202_v38 }
 0x292   : > { %v1814_v44 = vpop.f32.mrb[27].mxu1 }
 0x293   : > { %v1114_v45 = vadd.f32 %v1812_v42, %v2674_v39  ;;  %v1815_v46 = vadd.f32 %v1814_v44, %v1813_v55  ;;  %1937 = vmatmul.mubr.bf16.gmra.mrb[72].mxu0 %v1229_v43 }
 0x295   : > { %v1117_v47 = vadd.f32 %v1815_v46, %v2674_v39  ;;  %v1204_v48 = vmax.f32 %v1114_v45, 0.0 }
 0x297   : > { %v1205_v49 = vmax.f32 %v1117_v47, 0.0  ;;  %v1816_v50 = vpop.f32.mrb[28].mxu1 }
 0x298   : > { %v1817_v51 = vpop.f32.mrb[29].mxu1 }
 0x299   : > { %v1818_v52 = vadd.f32 %v1817_v51, %v1816_v50  ;;  %v1819_v53 = vpop.f32.mrb[30].mxu1  ;;  %v1230_v56 = vpack.c.bf16 %v1205_v49, %v1204_v48 }
 0x29a   : > { %v1820_v57 = vpop.f32.mrb[31].mxu1 }
 0x29b   : > { %v1122_v58 = vadd.f32 %v1818_v52, %v2674_v39  ;;  %v1821_v59 = vadd.f32 %v1820_v57, %v1819_v53  ;;  %1940 = vmatprep.mubr.bf16.mxu0 %v1230_v56 }
 0x29d   : > { %v1125_v60 = vadd.f32 %v1821_v59, %v2674_v39  ;;  %v1206_v61 = vmax.f32 %v1122_v58, 0.0 }
 0x29f   : > { %v1207_v62 = vmax.f32 %v1125_v60, 0.0  ;;  %v1822_v63 = vpop.f32.mrb[32].mxu1 }
 0x2a0   : > { %v1823_v0 = vpop.f32.mrb[33].mxu1 }
 0x2a1   : > { %v1824_v1 = vadd.f32 %v1823_v0, %v1822_v63  ;;  %v1825_v2 = vpop.f32.mrb[34].mxu1  ;;  %v1231_v3 = vpack.c.bf16 %v1207_v62, %v1206_v61 }
 0x2a2   : > { %v1826_v4 = vpop.f32.mrb[35].mxu1 }
 0x2a3   : > { %v1130_v5 = vadd.f32 %v1824_v1, %v2674_v39  ;;  %v1827_v6 = vadd.f32 %v1826_v4, %v1825_v2  ;;  %1941 = vmatmul.mubr.bf16.gmra.mrb[76].mxu0 %v1231_v3 }
 0x2a5   : > { %v1133_v7 = vadd.f32 %v1827_v6, %v2674_v39  ;;  %v1208_v8 = vmax.f32 %v1130_v5, 0.0 }
 0x2a7   : > { %v1209_v9 = vmax.f32 %v1133_v7, 0.0  ;;  %v1828_v10 = vpop.f32.mrb[36].mxu1 }
 0x2a8   : > { %v1829_v11 = vpop.f32.mrb[37].mxu1 }
 0x2a9   : > { %v1830_v12 = vadd.f32 %v1829_v11, %v1828_v10  ;;  %v1831_v13 = vpop.f32.mrb[38].mxu1  ;;  %v1232_v14 = vpack.c.bf16 %v1209_v9, %v1208_v8 }
 0x2aa   : > { %v1832_v15 = vpop.f32.mrb[39].mxu1 }
 0x2ab   : > { %v1138_v16 = vadd.f32 %v1830_v12, %v2674_v39  ;;  %v1833_v17 = vadd.f32 %v1832_v15, %v1831_v13  ;;  %1944 = vmatprep.mubr.bf16.mxu0 %v1232_v14 }
 0x2ad   : > { %v1141_v18 = vadd.f32 %v1833_v17, %v2674_v39  ;;  %v1210_v19 = vmax.f32 %v1138_v16, 0.0 }
 0x2af   : > { %v1211_v20 = vmax.f32 %v1141_v18, 0.0  ;;  %v1834_v21 = vpop.f32.mrb[40].mxu1 }
 0x2b0   : > { %v1835_v22 = vpop.f32.mrb[41].mxu1 }
 0x2b1   : > { %v1233_v23 = vpack.c.bf16 %v1211_v20, %v1210_v19  ;;  %v1836_v24 = vadd.f32 %v1835_v22, %v1834_v21  ;;  %v1837_v25 = vpop.f32.mrb[42].mxu1 }
 0x2b2   : > { %v1838_v26 = vpop.f32.mrb[43].mxu1 }
 0x2b3   : > { %1945 = vmatmul.mubr.bf16.gmra.mrb[80].mxu0 %v1233_v23  ;;  %v1146_v27 = vadd.f32 %v1836_v24, %v2674_v39  ;;  %v1839_v28 = vadd.f32 %v1838_v26, %v1837_v25  ;;  %v2711_v25 = vld [vmem:[%s2825_s6] ss:$0 sm:$0xff] }
 0x2b5   : > { %v1149_v29 = vadd.f32 %v1839_v28, %v2674_v39  ;;  %v1212_v30 = vmax.f32 %v1146_v27, 0.0 }
 0x2b7   : > { %v1213_v31 = vmax.f32 %v1149_v29, 0.0  ;;  %v1840_v32 = vpop.f32.mrb[44].mxu1 }
 0x2b8   : > { %v1841_v33 = vpop.f32.mrb[45].mxu1 }
 0x2b9   : > { %v1842_v34 = vadd.f32 %v1841_v33, %v1840_v32  ;;  %v1843_v35 = vpop.f32.mrb[46].mxu1  ;;  %v1234_v36 = vpack.c.bf16 %v1213_v31, %v1212_v30 }
 0x2ba   : > { %v1844_v37 = vpop.f32.mrb[47].mxu1 }
 0x2bb   : > { %v1154_v38 = vadd.f32 %v1842_v34, %v2674_v39  ;;  %v1845_v40 = vadd.f32 %v1844_v37, %v1843_v35  ;;  %1948 = vmatprep.mubr.bf16.mxu0 %v1234_v36 }
 0x2bd   : > { %v1157_v54 = vadd.f32 %v1845_v40, %v2674_v39  ;;  %v1214_v41 = vmax.f32 %v1154_v38, 0.0 }
 0x2bf   : > { %v1215_v42 = vmax.f32 %v1157_v54, 0.0  ;;  %v1846_v55 = vpop.f32.mrb[48].mxu1 }
 0x2c0   : > { %v1847_v43 = vpop.f32.mrb[49].mxu1 }
 0x2c1   : > { %v1235_v44 = vpack.c.bf16 %v1215_v42, %v1214_v41  ;;  %v1848_v45 = vadd.f32 %v1847_v43, %v1846_v55  ;;  %v1849_v46 = vpop.f32.mrb[50].mxu1 }
 0x2c2   : > { %v1850_v47 = vpop.f32.mrb[51].mxu1 }
 0x2c3   : > { %1949 = vmatmul.mubr.bf16.gmra.mrb[84].mxu0 %v1235_v44  ;;  %v1162_v48 = vadd.f32 %v1848_v45, %v2674_v39  ;;  %v1851_v49 = vadd.f32 %v1850_v47, %v1849_v46 }
 0x2c5   : > { %v1165_v50 = vadd.f32 %v1851_v49, %v2674_v39  ;;  %v1216_v51 = vmax.f32 %v1162_v48, 0.0 }
 0x2c7   : > { %v1217_v52 = vmax.f32 %v1165_v50, 0.0  ;;  %v1852_v53 = vpop.f32.mrb[52].mxu1 }
 0x2c8   : > { %v1853_v56 = vpop.f32.mrb[53].mxu1 }
 0x2c9   : > { %v1854_v57 = vadd.f32 %v1853_v56, %v1852_v53  ;;  %v1855_v58 = vpop.f32.mrb[54].mxu1  ;;  %v1236_v59 = vpack.c.bf16 %v1217_v52, %v1216_v51 }
 0x2ca   : > { %v1856_v60 = vpop.f32.mrb[55].mxu1 }
 0x2cb   : > { %v1170_v61 = vadd.f32 %v1854_v57, %v2674_v39  ;;  %v1857_v62 = vadd.f32 %v1856_v60, %v1855_v58  ;;  %1952 = vmatprep.mubr.bf16.mxu0 %v1236_v59 }
 0x2cd   : > { %v1173_v63 = vadd.f32 %v1857_v62, %v2674_v39  ;;  %v1218_v0 = vmax.f32 %v1170_v61, 0.0 }
 0x2cf   : > { %v1219_v1 = vmax.f32 %v1173_v63, 0.0  ;;  %v1858_v2 = vpop.f32.mrb[56].mxu1 }
 0x2d0   : > { %v1859_v3 = vpop.f32.mrb[57].mxu1 }
 0x2d1   : > { %v1237_v4 = vpack.c.bf16 %v1219_v1, %v1218_v0  ;;  %v1860_v5 = vadd.f32 %v1859_v3, %v1858_v2  ;;  %v1861_v6 = vpop.f32.mrb[58].mxu1 }
 0x2d2   : > { %v1862_v7 = vpop.f32.mrb[59].mxu1 }
 0x2d3   : > { %1953 = vmatmul.mubr.bf16.gmra.mrb[88].mxu0 %v1237_v4  ;;  %v1178_v8 = vadd.f32 %v1860_v5, %v2674_v39  ;;  %v1863_v9 = vadd.f32 %v1862_v7, %v1861_v6 }
 0x2d5   : > { %v1181_v10 = vadd.f32 %v1863_v9, %v2674_v39  ;;  %v1220_v11 = vmax.f32 %v1178_v8, 0.0 }
 0x2d7   : > { %v1221_v12 = vmax.f32 %v1181_v10, 0.0  ;;  %v1864_v13 = vpop.f32.mrb[60].mxu1 }
 0x2d8   : > { %v1865_v14 = vpop.f32.mrb[61].mxu1 }
 0x2d9   : > { %v1866_v15 = vadd.f32 %v1865_v14, %v1864_v13  ;;  %v1867_v16 = vpop.f32.mrb[62].mxu1  ;;  %v1238_v17 = vpack.c.bf16 %v1221_v12, %v1220_v11 }
 0x2da   : > { %v1868_v18 = vpop.f32.mrb[63].mxu1 }
 0x2db   : > { %v1186_v19 = vadd.f32 %v1866_v15, %v2674_v39  ;;  %v1869_v20 = vadd.f32 %v1868_v18, %v1867_v16  ;;  %1956 = vmatprep.mubr.bf16.mxu0 %v1238_v17 }
 0x2dd   : > { %v1189_v21 = vadd.f32 %v1869_v20, %v2674_v39  ;;  %v1222_v22 = vmax.f32 %v1186_v19, 0.0  ;;  %v2719_v39 = vld [vmem:[%s2826_s7] sm:$0xf] }
 0x2de   : > { %1910 = vmatprep.mubr.bf16.mxu1 %v2719_v39 }
 0x2df   : > { %v1223_v23 = vmax.f32 %v1189_v21, 0.0 }
 0x2e1   : > { %v1239_v24 = vpack.c.bf16 %v1223_v23, %v1222_v22 }
 0x2e3   : > { %1957 = vmatmul.mubr.bf16.gmra.mrb[92].mxu0 %v1239_v24 }
 0x346   : > { %v1930_v26 = vpop.f32.mrb[64].mxu0 }
 0x347   : > { %v1354_v27 = vadd.f32 %v1930_v26, %v2711_v25  ;;  %v1345_v28 = vpop.f32.mrb[65].mxu0 }
 0x348   : > { %v1346_v29 = vadd.f32 %v2711_v25, %v1345_v28  ;;  %v1931_v30 = vpop.f32.mrb[66].mxu0 }
 0x349   : > { %v1357_v31 = vadd.f32 %v1931_v30, %v2711_v25  ;;  %v1348_v32 = vpop.f32.mrb[67].mxu0  ;;  %v1474_v34 = vmax.f32 %v1354_v27, 0.0 }
 0x34a   : > { %v1349_v33 = vadd.f32 %v2711_v25, %v1348_v32  ;;  %v1472_v36 = vmax.f32 %v1346_v29, 0.0 }
 0x34b   : > { %v1475_v35 = vmax.f32 %v1357_v31, 0.0 }
 0x34c   : > { %v1473_v37 = vmax.f32 %v1349_v33, 0.0 }
 0x34d   : > { %v2723_v38 = vpack.c.bf16 %v1475_v35, %v1474_v34 }
 0x34e   : > { %v1504_v40 = vpack.c.bf16 %v1473_v37, %v1472_v36 }
 0x356   : > { %v1934_v54 = vpop.f32.mrb[68].mxu0 }
 0x357   : > { %v1370_v41 = vadd.f32 %v1934_v54, %v2711_v25  ;;  %v1361_v42 = vpop.f32.mrb[69].mxu0 }
 0x358   : > { %v1362_v55 = vadd.f32 %v2711_v25, %v1361_v42  ;;  %v1935_v43 = vpop.f32.mrb[70].mxu0 }
 0x359   : > { %v1373_v44 = vadd.f32 %v1935_v43, %v2711_v25  ;;  %v1364_v45 = vpop.f32.mrb[71].mxu0  ;;  %v1478_v47 = vmax.f32 %v1370_v41, 0.0 }
 0x35a   : > { %v1365_v46 = vadd.f32 %v2711_v25, %v1364_v45  ;;  %v1476_v49 = vmax.f32 %v1362_v55, 0.0 }
 0x35b   : > { %v1479_v48 = vmax.f32 %v1373_v44, 0.0 }
 0x35c   : > { %v1477_v50 = vmax.f32 %v1365_v46, 0.0 }
 0x35d   : > { %v2729_v51 = vpack.c.bf16 %v1479_v48, %v1478_v47 }
 0x35e   : > { %v1506_v52 = vpack.c.bf16 %v1477_v50, %v1476_v49 }
 0x366   : > { %v1938_v53 = vpop.f32.mrb[72].mxu0 }
 0x367   : > { %v1386_v56 = vadd.f32 %v1938_v53, %v2711_v25  ;;  %v1377_v57 = vpop.f32.mrb[73].mxu0 }
 0x368   : > { %v1378_v58 = vadd.f32 %v2711_v25, %v1377_v57  ;;  %v1939_v59 = vpop.f32.mrb[74].mxu0 }
 0x369   : > { %v1389_v60 = vadd.f32 %v1939_v59, %v2711_v25  ;;  %v1380_v61 = vpop.f32.mrb[75].mxu0  ;;  %v1482_v63 = vmax.f32 %v1386_v56, 0.0 }
 0x36a   : > { %v1381_v62 = vadd.f32 %v2711_v25, %v1380_v61  ;;  %v1480_v1 = vmax.f32 %v1378_v58, 0.0 }
 0x36b   : > { %v1483_v0 = vmax.f32 %v1389_v60, 0.0 }
 0x36c   : > { %v1481_v2 = vmax.f32 %v1381_v62, 0.0 }
 0x36d   : > { %v2735_v3 = vpack.c.bf16 %v1483_v0, %v1482_v63 }
 0x36e   : > { %v2737_v4 = vpack.c.bf16 %v1481_v2, %v1480_v1 }
 0x376   : > { %v1942_v5 = vpop.f32.mrb[76].mxu0 }
 0x377   : > { %v1402_v6 = vadd.f32 %v1942_v5, %v2711_v25  ;;  %v1393_v7 = vpop.f32.mrb[77].mxu0 }
 0x378   : > { %v1394_v8 = vadd.f32 %v2711_v25, %v1393_v7  ;;  %v1943_v9 = vpop.f32.mrb[78].mxu0 }
 0x379   : > { %v1405_v10 = vadd.f32 %v1943_v9, %v2711_v25  ;;  %v1396_v11 = vpop.f32.mrb[79].mxu0  ;;  %v1486_v13 = vmax.f32 %v1402_v6, 0.0 }
 0x37a   : > { %v1397_v12 = vadd.f32 %v2711_v25, %v1396_v11  ;;  %v1484_v15 = vmax.f32 %v1394_v8, 0.0 }
 0x37b   : > { %v1487_v14 = vmax.f32 %v1405_v10, 0.0 }
 0x37c   : > { %v1485_v16 = vmax.f32 %v1397_v12, 0.0 }
 0x37d   : > { %v2743_v17 = vpack.c.bf16 %v1487_v14, %v1486_v13 }
 0x37e   : > { %v2745_v18 = vpack.c.bf16 %v1485_v16, %v1484_v15 }
 0x386   : > { %v1946_v19 = vpop.f32.mrb[80].mxu0 }
 0x387   : > { %v1418_v20 = vadd.f32 %v1946_v19, %v2711_v25  ;;  %v1409_v21 = vpop.f32.mrb[81].mxu0 }
 0x388   : > { %v1410_v22 = vadd.f32 %v2711_v25, %v1409_v21  ;;  %v1947_v23 = vpop.f32.mrb[82].mxu0 }
 0x389   : > { %v1421_v24 = vadd.f32 %v1947_v23, %v2711_v25  ;;  %v1412_v26 = vpop.f32.mrb[83].mxu0  ;;  %v1490_v28 = vmax.f32 %v1418_v20, 0.0 }
 0x38a   : > { %v1413_v27 = vadd.f32 %v2711_v25, %v1412_v26  ;;  %v1488_v30 = vmax.f32 %v1410_v22, 0.0 }
 0x38b   : > { %v1491_v29 = vmax.f32 %v1421_v24, 0.0 }
 0x38c   : > { %v1489_v31 = vmax.f32 %v1413_v27, 0.0 }
 0x38d   : > { %v1513_v32 = vpack.c.bf16 %v1491_v29, %v1490_v28 }
 0x38e   : > { %v1512_v33 = vpack.c.bf16 %v1489_v31, %v1488_v30 }
 0x390   : > { %1894 = vmatprep.subr.bf16.mxu1 %v1512_v33 }
 0x391   : > { %1895 = vmatpush3.bf16.xpose.msra.mxu1 %v1504_v40 }
 0x392   : > { %1896 = vmatprep.subr.bf16.mxu1 %v1513_v32 }
 0x396   : > { %v1950_v34 = vpop.f32.mrb[84].mxu0 }
 0x397   : > { %v1434_v35 = vadd.f32 %v1950_v34, %v2711_v25  ;;  %v1425_v36 = vpop.f32.mrb[85].mxu0 }
 0x398   : > { %v1426_v37 = vadd.f32 %v2711_v25, %v1425_v36  ;;  %v1951_v54 = vpop.f32.mrb[86].mxu0 }
 0x399   : > { %v1437_v41 = vadd.f32 %v1951_v54, %v2711_v25  ;;  %v1428_v42 = vpop.f32.mrb[87].mxu0  ;;  %1897 = vmatpush3.bf16.xpose.msra.mxu1 %v2723_v38  ;;  %v1494_v43 = vmax.f32 %v1434_v35, 0.0 }
 0x39a   : > { %v1429_v55 = vadd.f32 %v2711_v25, %v1428_v42  ;;  %v1492_v45 = vmax.f32 %v1426_v37, 0.0 }
 0x39b   : > { %v1495_v44 = vmax.f32 %v1437_v41, 0.0 }
 0x39c   : > { %v1493_v46 = vmax.f32 %v1429_v55, 0.0 }
 0x39d   : > { %v1515_v40 = vpack.c.bf16 %v1495_v44, %v1494_v43 }
 0x39e   : > { %v1514_v47 = vpack.c.bf16 %v1493_v46, %v1492_v45 }
 0x3a0   : > { %1898 = vmatprep.subr.bf16.mxu1 %v1514_v47 }
 0x3a1   : > { %1899 = vmatpush3.bf16.xpose.msra.mxu1 %v1506_v52 }
 0x3a2   : > { %1900 = vmatprep.subr.bf16.mxu1 %v1515_v40 }
 0x3a6   : > { %v1954_v48 = vpop.f32.mrb[88].mxu0 }
 0x3a7   : > { %v1450_v49 = vadd.f32 %v1954_v48, %v2711_v25  ;;  %v1441_v50 = vpop.f32.mrb[89].mxu0 }
 0x3a8   : > { %v1442_v53 = vadd.f32 %v2711_v25, %v1441_v50  ;;  %v1955_v56 = vpop.f32.mrb[90].mxu0 }
 0x3a9   : > { %v1453_v38 = vadd.f32 %v1955_v56, %v2711_v25  ;;  %v1444_v57 = vpop.f32.mrb[91].mxu0  ;;  %1901 = vmatpush3.bf16.xpose.msra.mxu1 %v2729_v51  ;;  %v1498_v59 = vmax.f32 %v1450_v49, 0.0 }
 0x3aa   : > { %v1445_v58 = vadd.f32 %v2711_v25, %v1444_v57  ;;  %v1496_v61 = vmax.f32 %v1442_v53, 0.0 }
 0x3ab   : > { %v1499_v60 = vmax.f32 %v1453_v38, 0.0 }
 0x3ac   : > { %v1497_v62 = vmax.f32 %v1445_v58, 0.0 }
 0x3ad   : > { %v1517_v52 = vpack.c.bf16 %v1499_v60, %v1498_v59 }
 0x3ae   : > { %v1516_v63 = vpack.c.bf16 %v1497_v62, %v1496_v61 }
 0x3b0   : > { %1902 = vmatprep.subr.bf16.mxu1 %v1516_v63 }
 0x3b1   : > { %1903 = vmatpush3.bf16.xpose.msra.mxu1 %v2737_v4 }
 0x3b2   : > { %1904 = vmatprep.subr.bf16.mxu1 %v1517_v52 }
 0x3b6   : > { %v1958_v0 = vpop.f32.mrb[92].mxu0 }
 0x3b7   : > { %v1466_v1 = vadd.f32 %v1958_v0, %v2711_v25  ;;  %v1457_v2 = vpop.f32.mrb[93].mxu0 }
 0x3b8   : > { %v1458_v5 = vadd.f32 %v2711_v25, %v1457_v2  ;;  %v1959_v6 = vpop.f32.mrb[94].mxu0 }
 0x3b9   : > { %v1469_v51 = vadd.f32 %v1959_v6, %v2711_v25  ;;  %v1460_v7 = vpop.f32.mrb[95].mxu0  ;;  %1905 = vmatpush3.bf16.xpose.msra.mxu1 %v2735_v3  ;;  %v1502_v9 = vmax.f32 %v1466_v1, 0.0 }
 0x3ba   : > { %v1461_v8 = vadd.f32 %v2711_v25, %v1460_v7  ;;  %v1500_v4 = vmax.f32 %v1458_v5, 0.0 }
 0x3bb   : > { %v1503_v10 = vmax.f32 %v1469_v51, 0.0 }
 0x3bc   : > { %v1501_v11 = vmax.f32 %v1461_v8, 0.0 }
 0x3bd   : > { %v1519_v12 = vpack.c.bf16 %v1503_v10, %v1502_v9 }
 0x3be   : > { %v1518_v13 = vpack.c.bf16 %v1501_v11, %v1500_v4 }
 0x3c0   : > { %1906 = vmatprep.subr.bf16.mxu1 %v1518_v13 }
 0x3c1   : > { %1907 = vmatpush3.bf16.xpose.msra.mxu1 %v2745_v18 }
 0x3c2   : > { %1908 = vmatprep.subr.bf16.mxu1 %v1519_v12 }
 0x3c9   : > { %1909 = vmatpush3.bf16.xpose.msra.mxu1 %v2743_v17 }
 0x3d0   : > { %1911 = vmatmul.mubr.bf16.vlgmr.msra.gmra.mrb[64].mxu1 %v2719_v39 }
 0x4a3   : > { %v1555_v25 = vpop.f32.mrb[64].mxu1 }
 0x4a4   : > { %1562 = vst [vmem:[%s367_s15] sm:$0xff] %v1555_v25  ;;  %v1557_v3 = vpop.f32.mrb[65].mxu1 }
 0x4a5   : > { %1563 = vst [vmem:[%s367_s15 + $0x8] sm:$0xff] %v1557_v3  ;;  %v1559_v39 = vpop.f32.mrb[66].mxu1 }
 0x4a6   : > { %v1560_v14 = vpop.f32.mrb[67].mxu1 }
 0x4a7   : > { %2233 = shalt.err (!%p2230_p4)
}
 0x4a8   : > { %s2234_s24 = scalar_lea.hbm %s2777_s10, 256  ;;  %s2238_s1 = scalar_lea.hbm %s2827_s8, 512 }
 0x4a9   : > { %p2235_p9 = scmp.ne.s32.totalorder %s2777_s10, %s2234_s24  ;;  %p2239_p8 = scmp.lt.u32.totalorder %s2777_s10, %s2827_s8 }
 0x4aa   : > { %p2240_p13 = scmp.lt.u32.totalorder %s2238_s1, %s2234_s24  ;;  %p2242_p10 = scmp.lt.u32.totalorder %s2234_s24, %s2777_s10 }
 0x4ab   : > { %p2236_p0 = pnand %p2235_p9, %p2499_p5 }
 0x4ac   : > { %p2241_p6 = por %p2240_p13, %p2239_p8 }
 0x4ad   : > { %p2237_p11 = pneg %p2236_p0 }
 0x4ae   : > { %p2243_p3 = por %p2242_p10, %p2241_p6 }
 0x4b0   : > { %p2244_p7 = pnand %p2243_p3, %p2237_p11 }
 0x4b2   : > { %2247 = shalt.err (!%p2244_p7)
}
 0x4b3   : > { %1974 = dma.vmem_to_hbm [thread:$0]  (%p2499_p5), %s2772_s16, 256, %s2777_s10, %s1565_s11  }
 0x4b4 PF: > { %s2851_s15 = sld [smem:[#allocation15_spill]]  ;;  %s2852_s23 = sld [smem:[#allocation16_spill]] }
 0x4b5   : > { %p2854_p2 = scmp.ge.s32.totalorder %s2294_s30, 2 }
 0x4ba   : > { %s1591_s25 = sand.u32 1, %s2851_s15   ;;  %p2853_p12 = scmp.ne.s32.totalorder %s2852_s23, 0 }
 0x4bb   : > { %s1592_s26 = scalar_lea.sflag [#allocation4], %s1591_s25 }
 0x4bc   : > { %p1991_p1 = pnand %p2854_p2, %p2853_p12 }
 0x4be   : > { %2277 = dma.done.wait (!%p1991_p1), %s1592_s26, 256  }
 0x4bf   : > { %2279 = vsyncadd (!%p1991_p1), %s1592_s26, 4294967040  ;;  %p23_p4 = scmp.ge.s32.totalorder %s2464_s22, 4   ;;  %s2855_s27 = smov %s2286_s28 }
 0x4c0   : > { %s2856_s28 = smov %s2290_s29  ;;  %s2857_s29 = smov %s2495_s17 }
 0x4c1   : > { %s2858_s30 = smov %s2464_s22  ;;  %25 = sbr.rel (!%p23_p4) target bundleno = 9 (0x9), region = 109 }
 0x4c8   :  { %1597 = vsyncpa [#allocation3], 1 }
 0x4c9   :  { %1599 = vsyncpa [#allocation3 + $0x1], 1 }
 0x4ca   :  { %1600 = vsyncpa [#allocation6], 1 }
 0x4cb   :  { %1601 = vsyncpa [#allocation9], 1 }
 0x4cc   :  { %1602 = vsyncpa [#allocation4], 1 }
 0x4cd   :  { %1604 = vsyncpa [#allocation4 + $0x1], 1 }

</bundles_post_ra>
